<compile_context>
chip_gen: v5e
topology: v5e:2x2
jax: 0.10.0
libtpu: 0.0.40
codegen_flags: <defaults>
</compile_context>

<pallas_src>
import jax
import jax.numpy as jnp
from jax import lax
from jax.experimental import pallas as pl
from jax.experimental.pallas import tpu as pltpu

H1 = 256
H2 = 128
_LANE = 128
_GRANULE = 256          # batch-tile granularity (multiple of 128 lanes / MXU rows)
_PREFERRED_TILE = 2048  # default max batch tile


def _round_up(x, m):
    return -(-x // m) * m


def _reward_kernel(state_ref, action_ref, w1s_ref, w1a_ref, b1_ref,
                   w2_ref, b2_ref, w3_ref, b3_ref, o_ref):
    dot_dtype = w1s_ref.dtype

    # Cast the batch-major input tiles to the MXU dtype on the VPU (no extra
    # HBM pass; the f32 input DMA is hidden under the MXU work).
    s = state_ref[...].astype(dot_dtype)     # (bt, S)
    a = action_ref[...].astype(dot_dtype)    # (bt, A)

    # Layer 1, feature-major with split-K over the state/action concat:
    #   h1[f, b] = sum_k W1s[f, k] * s[b, k] + sum_k W1a[f, k] * a[b, k]
    dn = (((1,), (1,)), ((), ()))
    h1 = lax.dot_general(w1s_ref[...], s, dn, preferred_element_type=jnp.float32)
    h1 = h1 + lax.dot_general(w1a_ref[...], a, dn,
                              preferred_element_type=jnp.float32)
    h1 = jnp.maximum(h1 + b1_ref[...], 0.0)              # (H1, bt) f32

    # Layer 2: W2^T (H2, H1) @ h1 (H1, bt) -> (H2, bt).  Plain NN matmul.
    h2 = jnp.dot(w2_ref[...], h1.astype(dot_dtype),
                 preferred_element_type=jnp.float32)
    h2 = jnp.maximum(h2 + b2_ref[...], 0.0)              # (H2, bt) f32

    # Head: (8, H2) @ (H2, bt) -> (8, bt).  Only row 0 is real (rows 1-7 of the
    # padded weight block are exactly zero); the result is already lane-dense
    # over batch so no transpose is needed before the store.
    out = jnp.dot(w3_ref[...], h2.astype(dot_dtype),
                  preferred_element_type=jnp.float32)
    o_ref[...] = (out[0:1, :] + b3_ref[0, 0]).astype(o_ref.dtype)


def _choose_batch_tile(batch, preferred=_PREFERRED_TILE, granule=_GRANULE):
    """Multiple of `granule`, <= preferred, small enough that the grid has at
    least two tiles whenever the batch allows it (v7x has 2 TensorCores)."""
    b_ceil = _round_up(batch, granule)
    if b_ceil <= granule:
        return granule
    half = max(granule, (b_ceil // 2) // granule * granule)
    return min(preferred, half)


def _vmem_limit_bytes(batch_tile, state_dim, action_dim, dot_itemsize):
    """Tile-derived VMEM request (2x headroom), clamped to [16 MiB, 32 MiB]."""
    def lane_pad(d):
        return _round_up(d, _LANE)
    # Double-buffered, lane-padded f32 input tiles (state + action streams).
    inputs = 2 * batch_tile * (lane_pad(state_dim) + lane_pad(action_dim)) * 4
    # f32 intermediates + dot-dtype copies + (8, bt) head tile.
    inter = batch_tile * ((H1 + H2) * 4 + (H1 + H2) * dot_itemsize) \
        + 8 * batch_tile * 4
    fixed = 2 * (1 << 20)   # resident weights / biases / output row + slack
    est = 2 * (inputs + inter) + fixed
    return int(min(32 * (1 << 20), max(16 * (1 << 20), est)))


def reward_network_forward(state, action, params, *, batch_tile=None,
                           dot_dtype=jnp.bfloat16):
    """Fused 3-layer MLP reward network.

    state:  (B, state_dim)  float32
    action: (B, action_dim) float32
    returns (B, 1) float32

    dot_dtype=jnp.bfloat16 (default) feeds the MXU with bf16 operands while
    keeping all accumulation in f32; use dot_dtype=jnp.float32 for parity
    tests against the torch reference (bit-exactness is not expected in bf16).
    """
    w1, b1, w2, b2, w3, b3 = params
    B, s_dim = state.shape
    a_dim = action.shape[1]
    assert w1.shape == (s_dim + a_dim, H1), w1.shape

    if batch_tile is None:
        batch_tile = _choose_batch_tile(B)
    b_pad = _round_up(B, batch_tile)
    num_tiles = b_pad // batch_tile

    state = state.astype(jnp.float32)
    action = action.astype(jnp.float32)
    if b_pad != B:
        # Only for ragged batches; padded rows are independent and sliced off
        # below, so no in-kernel masking is needed.
        state = jnp.pad(state, ((0, b_pad - B), (0, 0)))
        action = jnp.pad(action, ((0, b_pad - B), (0, 0)))

    # Feature-major resident weights.  The head row is zero-padded to 8 rows
    # (one MXU pass either way); rows 1-7 MUST remain zero for correctness.
    w1s_t = w1[:s_dim].T.astype(dot_dtype)                          # (H1, S)
    w1a_t = w1[s_dim:].T.astype(dot_dtype)                          # (H1, A)
    w2_t = w2.T.astype(dot_dtype)                                   # (H2, H1)
    w3_t = jnp.zeros((8, H2), dot_dtype).at[0].set(w3[:, 0].astype(dot_dtype))
    b1c = jnp.asarray(b1, jnp.float32).reshape(H1, 1)
    b2c = jnp.asarray(b2, jnp.float32).reshape(H2, 1)
    b3c = jnp.asarray(b3, jnp.float32).reshape(1, 1)

    in_specs = [
        pl.BlockSpec((batch_tile, s_dim), lambda i: (i, 0)),   # state tile
        pl.BlockSpec((batch_tile, a_dim), lambda i: (i, 0)),   # action tile
        pl.BlockSpec((H1, s_dim), lambda i: (0, 0)),           # W1[:S]^T (resident)
        pl.BlockSpec((H1, a_dim), lambda i: (0, 0)),           # W1[S:]^T (resident)
        pl.BlockSpec((H1, 1), lambda i: (0, 0)),               # b1
        pl.BlockSpec((H2, H1), lambda i: (0, 0)),              # W2^T (resident)
        pl.BlockSpec((H2, 1), lambda i: (0, 0)),               # b2
        pl.BlockSpec((8, H2), lambda i: (0, 0)),               # W3 row (padded)
        pl.BlockSpec(memory_space=pltpu.MemorySpace.SMEM),     # b3 scalar
    ]
    # Lane-dense output: batch along lanes, one row written per grid step.
    out_specs = pl.BlockSpec((1, batch_tile), lambda i: (0, i))

    out_row = pl.pallas_call(
        _reward_kernel,
        out_shape=jax.ShapeDtypeStruct((1, b_pad), jnp.float32),
        grid=(num_tiles,),
        in_specs=in_specs,
        out_specs=out_specs,
        compiler_params=pltpu.CompilerParams(
            dimension_semantics=("parallel",),
            vmem_limit_bytes=_vmem_limit_bytes(
                batch_tile, s_dim, a_dim, jnp.dtype(dot_dtype).itemsize)),
    )(state, action, w1s_t, w1a_t, b1c, w2_t, b2c, w3_t, b3c)

    return out_row[0, :B].reshape(B, 1)


def init_params(key, state_dim, action_dim):
    """Init mimicking nn.Linear's uniform(-1/sqrt(fan_in), +1/sqrt(fan_in)).

    Weights stored as (in_features, out_features) (transposed vs. torch)."""
    dims = [(state_dim + action_dim, H1), (H1, H2), (H2, 1)]
    keys = jax.random.split(key, 2 * len(dims))
    params = []
    for li, (fi, fo) in enumerate(dims):
        bound = 1.0 / (fi ** 0.5)
        w = jax.random.uniform(keys[2 * li], (fi, fo), jnp.float32, -bound, bound)
        b = jax.random.uniform(keys[2 * li + 1], (1, fo), jnp.float32, -bound, bound)
        params += [w, b]
    return tuple(params)   # (w1, b1, w2, b2, w3, b3)


def reference_forward(state, action, params):
    w1, b1, w2, b2, w3, b3 = params
    hp = jax.lax.Precision.HIGHEST
    x = jnp.concatenate([state, action], axis=-1)
    h1 = jax.nn.relu(jnp.dot(x, w1, precision=hp) + b1)
    h2 = jax.nn.relu(jnp.dot(h1, w2, precision=hp) + b2)
    return jnp.dot(h2, w3, precision=hp) + b3


if __name__ == "__main__":
    # Ragged batch (not a multiple of the tile) exercises the padding path;
    # padded batch = 512 -> 2-tile grid (shards across both v7x TensorCores).
    B, STATE_DIM, ACTION_DIM = 300, 16, 8

    key = jax.random.PRNGKey(0)
    k_s, k_a, k_p = jax.random.split(key, 3)
    state = jax.random.normal(k_s, (B, STATE_DIM), jnp.float32)
    action = jax.random.normal(k_a, (B, ACTION_DIM), jnp.float32)
    params = init_params(k_p, STATE_DIM, ACTION_DIM)

    ref = reference_forward(state, action, params)

    # Default fast path: bf16 MXU inputs, f32 accumulation (not bit-parity
    # with torch f32 -- expected abs error is O(1e-3) for these magnitudes).
    out_bf16 = jax.block_until_ready(reward_network_forward(state, action, params))
    assert out_bf16.shape == (B, 1), out_bf16.shape
    assert jnp.allclose(out_bf16, ref, atol=5e-2, rtol=0.0), \
        float(jnp.abs(out_bf16 - ref).max())

    # f32 parity path (exact torch semantics up to matmul rounding).
    out_f32 = jax.block_until_ready(
        reward_network_forward(state, action, params, dot_dtype=jnp.float32))
    assert out_f32.shape == (B, 1), out_f32.shape
    assert jnp.allclose(out_f32, ref, atol=2e-4, rtol=1e-4), \
        float(jnp.abs(out_f32 - ref).max())

    print("KERNEL_OK")
</pallas_src>

<mosaic_0001>
module attributes {stable_mosaic.version = 11 : i64} {
  func.func @_reward_kernel(%arg0: i32, %arg1: memref<256x16xf32, #tpu.memory_space<vmem>>, %arg2: memref<256x8xf32, #tpu.memory_space<vmem>>, %arg3: memref<256x16xbf16, #tpu.memory_space<vmem>>, %arg4: memref<256x8xbf16, #tpu.memory_space<vmem>>, %arg5: memref<256x1xf32, #tpu.memory_space<vmem>>, %arg6: memref<128x256xbf16, #tpu.memory_space<vmem>>, %arg7: memref<128x1xf32, #tpu.memory_space<vmem>>, %arg8: memref<8x128xbf16, #tpu.memory_space<vmem>>, %arg9: memref<1x1xf32, #tpu.memory_space<smem>>, %arg10: memref<1x256xf32, #tpu.memory_space<vmem>>) attributes {dimension_semantics = [#tpu.dimension_semantics<parallel>], iteration_bounds = array<i64: 2>, scalar_prefetch = 0 : i64, scratch_operands = 0 : i64, tpu.core_type = #tpu.core_type<tc>, window_params = [{transform_indices = @transform_0, window_bounds = array<i64: 256, 16>}, {transform_indices = @transform_1, window_bounds = array<i64: 256, 8>}, {pipeline_mode = #tpu.pipeline_mode<synchronous>, transform_indices = @transform_2, window_bounds = array<i64: 256, 16>}, {pipeline_mode = #tpu.pipeline_mode<synchronous>, transform_indices = @transform_3, window_bounds = array<i64: 256, 8>}, {pipeline_mode = #tpu.pipeline_mode<synchronous>, transform_indices = @transform_4, window_bounds = array<i64: 256, 1>}, {pipeline_mode = #tpu.pipeline_mode<synchronous>, transform_indices = @transform_5, window_bounds = array<i64: 128, 256>}, {pipeline_mode = #tpu.pipeline_mode<synchronous>, transform_indices = @transform_6, window_bounds = array<i64: 128, 1>}, {pipeline_mode = #tpu.pipeline_mode<synchronous>, transform_indices = @transform_7, window_bounds = array<i64: 8, 128>}, {transform_indices = @transform_8, window_bounds = array<i64: 1, 1>}, {transform_indices = @transform_9, window_bounds = array<i64: 1, 256>}]} {
    %c0 = arith.constant 0 : index
    %c0_0 = arith.constant 0 : index
    %0 = vector.load %arg1[%c0, %c0_0] : memref<256x16xf32, #tpu.memory_space<vmem>>, vector<256x16xf32>
    %1 = arith.truncf %0 : vector<256x16xf32> to vector<256x16xbf16>
    %c0_1 = arith.constant 0 : index
    %c0_2 = arith.constant 0 : index
    %2 = vector.load %arg2[%c0_1, %c0_2] : memref<256x8xf32, #tpu.memory_space<vmem>>, vector<256x8xf32>
    %3 = arith.truncf %2 : vector<256x8xf32> to vector<256x8xbf16>
    %c0_3 = arith.constant 0 : index
    %c0_4 = arith.constant 0 : index
    %4 = vector.load %arg3[%c0_3, %c0_4] : memref<256x16xbf16, #tpu.memory_space<vmem>>, vector<256x16xbf16>
    %cst = arith.constant dense<0.000000e+00> : vector<256x256xf32>
    %5 = tpu.matmul %4, %1, %cst {dimension_numbers = #tpu.dot_dimension_numbers<[1], [1], [0], [0], [0, 0, 1, 0], [], []>} : vector<256x16xbf16>, vector<256x16xbf16>, vector<256x256xf32> -> vector<256x256xf32>
    %c0_5 = arith.constant 0 : index
    %c0_6 = arith.constant 0 : index
    %6 = vector.load %arg4[%c0_5, %c0_6] : memref<256x8xbf16, #tpu.memory_space<vmem>>, vector<256x8xbf16>
    %cst_7 = arith.constant dense<0.000000e+00> : vector<256x256xf32>
    %7 = tpu.matmul %6, %3, %cst_7 {dimension_numbers = #tpu.dot_dimension_numbers<[1], [1], [0], [0], [0, 0, 1, 0], [], []>} : vector<256x8xbf16>, vector<256x8xbf16>, vector<256x256xf32> -> vector<256x256xf32>
    %8 = arith.addf %5, %7 : vector<256x256xf32>
    %c0_8 = arith.constant 0 : index
    %c0_9 = arith.constant 0 : index
    %9 = vector.load %arg5[%c0_8, %c0_9] : memref<256x1xf32, #tpu.memory_space<vmem>>, vector<256x1xf32>
    %10 = vector.broadcast %9 : vector<256x1xf32> to vector<256x256xf32>
    %11 = arith.addf %8, %10 : vector<256x256xf32>
    %cst_10 = arith.constant 0.000000e+00 : f32
    %12 = vector.broadcast %cst_10 : f32 to vector<256x256xf32>
    %13 = arith.maximumf %11, %12 : vector<256x256xf32>
    %c0_11 = arith.constant 0 : index
    %c0_12 = arith.constant 0 : index
    %14 = vector.load %arg6[%c0_11, %c0_12] : memref<128x256xbf16, #tpu.memory_space<vmem>>, vector<128x256xbf16>
    %15 = arith.truncf %13 : vector<256x256xf32> to vector<256x256xbf16>
    %cst_13 = arith.constant dense<0.000000e+00> : vector<128x256xf32>
    %16 = tpu.matmul %14, %15, %cst_13 {dimension_numbers = #tpu.dot_dimension_numbers<[1], [0], [0], [1], [0, 0, 1, 1], [], []>} : vector<128x256xbf16>, vector<256x256xbf16>, vector<128x256xf32> -> vector<128x256xf32>
    %c0_14 = arith.constant 0 : index
    %c0_15 = arith.constant 0 : index
    %17 = vector.load %arg7[%c0_14, %c0_15] : memref<128x1xf32, #tpu.memory_space<vmem>>, vector<128x1xf32>
    %18 = vector.broadcast %17 : vector<128x1xf32> to vector<128x256xf32>
    %19 = arith.addf %16, %18 : vector<128x256xf32>
    %cst_16 = arith.constant 0.000000e+00 : f32
    %20 = vector.broadcast %cst_16 : f32 to vector<128x256xf32>
    %21 = arith.maximumf %19, %20 : vector<128x256xf32>
    %c0_17 = arith.constant 0 : index
    %c0_18 = arith.constant 0 : index
    %22 = vector.load %arg8[%c0_17, %c0_18] : memref<8x128xbf16, #tpu.memory_space<vmem>>, vector<8x128xbf16>
    %23 = arith.truncf %21 : vector<128x256xf32> to vector<128x256xbf16>
    %cst_19 = arith.constant dense<0.000000e+00> : vector<8x256xf32>
    %24 = tpu.matmul %22, %23, %cst_19 {dimension_numbers = #tpu.dot_dimension_numbers<[1], [0], [0], [1], [0, 0, 1, 1], [], []>} : vector<8x128xbf16>, vector<128x256xbf16>, vector<8x256xf32> -> vector<8x256xf32>
    %25 = vector.extract_strided_slice %24 {offsets = [0, 0], sizes = [1, 256], strides = [1, 1]} : vector<8x256xf32> to vector<1x256xf32>
    %c0_20 = arith.constant 0 : index
    %c0_21 = arith.constant 0 : index
    %26 = memref.load %arg9[%c0_20, %c0_21] : memref<1x1xf32, #tpu.memory_space<smem>>
    %27 = vector.broadcast %26 : f32 to vector<1x256xf32>
    %28 = arith.addf %25, %27 : vector<1x256xf32>
    %c0_22 = arith.constant 0 : index
    %c0_23 = arith.constant 0 : index
    %29 = vector.load %arg10[%c0_22, %c0_23] : memref<1x256xf32, #tpu.memory_space<vmem>>, vector<1x256xf32>
    tpu.vector_store %arg10[%c0_22, %c0_23], %28 {strides = array<i32>} : memref<1x256xf32, #tpu.memory_space<vmem>>, vector<1x256xf32>,
    return
  }
  func.func @transform_0(%arg0: i32) -> (i32, i32) {
    %c0_i32 = arith.constant 0 : i32
    %c0_i32_0 = arith.constant 0 : i32
    return %arg0, %c0_i32 : i32, i32
  }
  func.func @transform_1(%arg0: i32) -> (i32, i32) {
    %c0_i32 = arith.constant 0 : i32
    %c0_i32_0 = arith.constant 0 : i32
    return %arg0, %c0_i32 : i32, i32
  }
  func.func @transform_2(%arg0: i32) -> (i32, i32) {
    %c0_i32 = arith.constant 0 : i32
    %c0_i32_0 = arith.constant 0 : i32
    %c0_i32_1 = arith.constant 0 : i32
    return %c0_i32, %c0_i32_0 : i32, i32
  }
  func.func @transform_3(%arg0: i32) -> (i32, i32) {
    %c0_i32 = arith.constant 0 : i32
    %c0_i32_0 = arith.constant 0 : i32
    %c0_i32_1 = arith.constant 0 : i32
    return %c0_i32, %c0_i32_0 : i32, i32
  }
  func.func @transform_4(%arg0: i32) -> (i32, i32) {
    %c0_i32 = arith.constant 0 : i32
    %c0_i32_0 = arith.constant 0 : i32
    %c0_i32_1 = arith.constant 0 : i32
    return %c0_i32, %c0_i32_0 : i32, i32
  }
  func.func @transform_5(%arg0: i32) -> (i32, i32) {
    %c0_i32 = arith.constant 0 : i32
    %c0_i32_0 = arith.constant 0 : i32
    %c0_i32_1 = arith.constant 0 : i32
    return %c0_i32, %c0_i32_0 : i32, i32
  }
  func.func @transform_6(%arg0: i32) -> (i32, i32) {
    %c0_i32 = arith.constant 0 : i32
    %c0_i32_0 = arith.constant 0 : i32
    %c0_i32_1 = arith.constant 0 : i32
    return %c0_i32, %c0_i32_0 : i32, i32
  }
  func.func @transform_7(%arg0: i32) -> (i32, i32) {
    %c0_i32 = arith.constant 0 : i32
    %c0_i32_0 = arith.constant 0 : i32
    %c0_i32_1 = arith.constant 0 : i32
    return %c0_i32, %c0_i32_0 : i32, i32
  }
  func.func @transform_8(%arg0: i32) -> (i32, i32) {
    %c0_i32 = arith.constant 0 : i32
    %c0_i32_0 = arith.constant 0 : i32
    %c0_i32_1 = arith.constant 0 : i32
    return %c0_i32, %c0_i32_0 : i32, i32
  }
  func.func @transform_9(%arg0: i32) -> (i32, i32) {
    %c0_i32 = arith.constant 0 : i32
    %c0_i32_0 = arith.constant 0 : i32
    return %c0_i32, %arg0 : i32, i32
  }
}

</mosaic_0001>

<bundles_post_ra>
// kernel: tpu_custom_call.1
= control target key start
LH: loop header
LB: loop body
LE: loop exit
PB: predicated region body
PF: predicated region fallthrough
CT: control target
= control target key end

     0   :  { %s3530_s0 = inlined_call_operand.vmem [shape: f32[512,16], index: 0, kind: input, shape index: {}]   ;;  %s3531_s1 = inlined_call_operand.vmem [shape: f32[512,8], index: 1, kind: input, shape index: {}]   ;;  %s3532_s2 = inlined_call_operand.vmem [shape: bf16[256,16], index: 2, kind: input, shape index: {}]   ;;  %s3533_s3 = inlined_call_operand.vmem [shape: bf16[256,8], index: 3, kind: input, shape index: {}]   ;;  %s3534_s4 = inlined_call_operand.vmem [shape: f32[256,1], index: 4, kind: input, shape index: {}]   ;;  %s3535_s5 = inlined_call_operand.vmem [shape: bf16[128,256], index: 5, kind: input, shape index: {}]   ;;  %s3536_s6 = inlined_call_operand.vmem [shape: f32[128,1], index: 6, kind: input, shape index: {}]   ;;  %s3537_s7 = inlined_call_operand.vmem [shape: bf16[8,128], index: 7, kind: input, shape index: {}]   ;;  %s3538_s8 = inlined_call_operand.<no memory space> [shape: f32[1,1], index: 8, kind: input, shape index: {}]   ;;  %s3539_s9 = inlined_call_operand.hbm [shape: f32[1,512], index: 9, kind: output, shape index: {}]  }
   0x1   :  { %14 = sst [smem:[#allocation2]] %s3538_s8 }
   0x2   :  { %15 = vsyncpa [#allocation4], 0 }
   0x3   :  { %17 = vsyncpa [#allocation4 + $0x1], 0  ;;  %s2622_s11 = smov 0   ;;  %s2624_s12 = smov 0  }
   0x4   :  { %s2626_s13 = smov 0   ;;  %s2628_s14 = smov 0  }
   0x5 LB: > { %s2643_s8 = sadd.s32 4294967295, %s2566_s14   ;;  %s2144_s15 = sadd.s32 4294967294, %s2566_s14   ;;  %s2566_s14 = sphi %s2628_s14, %s3582_s14   ;;  %s2562_s13 = sphi %s2626_s13, %s3581_s13   ;;  %s2558_s12 = sphi %s2624_s12, %s3580_s12   ;;  %s2554_s11 = sphi %s2622_s11, %s3579_s11  }
   0x6   : > { %s2647_s16 = sadd.s32 1, %s2566_s14   ;;  %s229_s17 = sadd.s32 1, %s2562_s13 }
   0x7   : > { %s226_s18 = ssub.s32 %s2566_s14, %s2647_s16  ;;  %p239_p0 = scmp.ne.s32.totalorder %s2562_s13, %s2558_s12 }
   0x8   : > { %p227_p1 = scmp.eq.s32.totalorder %s226_s18, 0  ;;  %p240_p2 = scmp.eq.s32.totalorder %s2643_s8, 1 }
   0x9   : > { %p245_p3 = scmp.ne.s32.totalorder %s2558_s12, %s2554_s11  ;;  %p246_p4 = scmp.eq.s32.totalorder %s2144_s15, 1 }
   0xa   : > { %s2658_s19 = scalar_select %p227_p1, %s2562_s13, %s229_s17  }
   0xb   : > { %p2660_p5 = por %p240_p2, %p239_p0  ;;  %p2664_p6 = por %p246_p4, %p245_p3 }
   0xc   : > { %p2147_p7 = scmp.ge.s32.totalorder %s2566_s14, 1  ;;  %p303_p8 = scmp.lt.s32.totalorder %s2566_s14, 3 }
   0xe   : > { %p304_p9 = pnand %p2147_p7, %p303_p8 }
  0x10   : > { %307 = sbr.rel (%p304_p9) target bundleno = 938 (0x3aa), region = 56 }
  0x15   : > { %s2149_s22 = sshll.u32 %s2643_s8, 5  ;;  %v1257_v0 = vld [vmem:[%s3534_s4 + $0xf0] sm:$0xff]  ;;  %v2568_v1 = vmov 0   ;;  %v1258_v2 = vld [vmem:[%s3534_s4 + $0xf8] sm:$0xff]  ;;  %vm597_vm0 = vcmask 64512   ;;  %vm952_vm1 = vcmask 130048  }
  0x16   : > { %p345_p10 = scmp.lt.s32.totalorder %s2149_s22, 63  ;;  %2502 = vset.pattern.permute.xlu1 %v2568_v1  ;;  %2501 = vset.pattern.permute.xlu0 %v2568_v1  ;;  %v1256_v31 = vld [vmem:[%s3534_s4 + $0xe8] sm:$0xff]  ;;  %v1241_v45 = vld [vmem:[%s3534_s4 + $0x70] sm:$0xff]  ;;  %v1239_v50 = vld [vmem:[%s3534_s4 + $0x60] sm:$0xff]  ;;  %s2042_s26 = sld [smem:[#allocation2]]  ;;  %vm2049_vm2 = vcmask 1040384  }
  0x17   : > { %1411 = vperm.xlu1 %2502, %v1257_v0   ;;  %2503 = vset.pattern.permute.xlu2 %v2568_v1  ;;  %v1253_v49 = vld [vmem:[%s3534_s4 + $0xd0] sm:$0xff]  ;;  %v1242_v61 = vld [vmem:[%s3534_s4 + $0x78] sm:$0xff]  ;;  %s341_s27 = sand.u32 1, %s2558_s12   ;;  %s2410_s30 = sshll.u32 %s2643_s8, 1 }
  0x18   : > { %s3584_s22 = smov (!%p345_p10, %s2149_s22), 63  ;;  %1331 = vperm.xlu0 %2501, %v1241_v45   ;;  %1321 = vperm.xlu2 %2503, %v1239_v50   ;;  %s2148_s29 = sshll.u32 %s341_s27, 1 }
  0x19   : > { %s2150_s25 = sshll.u32 %s3584_s22, 3  ;;  %s2068_s18 = scalar_lea.hbm %s3539_s9, %s2410_s30 }
  0x1a   : > { %s2677_s28 = scalar_lea.vmem %s3531_s1, %s2150_s25  ;;  %s2682_s10 = scalar_lea.vmem %s3530_s0, %s2150_s25 }
  0x1b   : > { %v435_v3 = vld [vmem:[%s2677_s28 + $0xf0] sm:$0xff]  ;;  %v436_v4 = vld [vmem:[%s2677_s28 + $0xf8] sm:$0xff]  ;;  %v433_v14 = vld [vmem:[%s2677_s28 + $0xe0] sm:$0xff]  ;;  %s343_s22 = scalar_lea.vmem [#allocation3], %s2148_s29  ;;  %s2058_s8 = scalar_lea.sflag [#allocation4], %s341_s27 }
  0x1c   : > { %v371_v5 = vld [vmem:[%s2682_s10 + $0x70] sm:$0xff]  ;;  %v452_v6 = vpack.c.bf16 %v436_v4, %v435_v3  ;;  %v372_v7 = vld [vmem:[%s2682_s10 + $0x78] sm:$0xff]  ;;  %v434_v17 = vld [vmem:[%s2677_s28 + $0xe8] sm:$0xff]  ;;  %s2070_s23 = sshll.u32 %s343_s22, 4  ;;  %s2524_s29 = scalar_lea.hbm %s3539_s9, 4  ;;  %s2071_s23 = int_to_ptr.vmem [resolvable:$true] %s2070_s23 }
  0x1d   : > { %v387_v8 = vld [vmem:[%s2682_s10 + $0xf0] sm:$0xff]  ;;  %v388_v9 = vld [vmem:[%s2682_s10 + $0xf8] sm:$0xff]  ;;  %v396_v10 = vpack.c.bf16 %v372_v7, %v371_v5  ;;  %v369_v18 = vld [vmem:[%s2682_s10 + $0x60] sm:$0xff]  ;;  %v451_v26 = vpack.c.bf16 %v434_v17, %v433_v14 }
  0x1e   : > { %v404_v11 = vpack.c.bf16 %v388_v9, %v387_v8  ;;  %v419_v12 = vld [vmem:[%s2677_s28 + $0x70] sm:$0xff]  ;;  %v420_v13 = vld [vmem:[%s2677_s28 + $0x78] sm:$0xff]  ;;  %v692_v15 = vsel %vm597_vm0, %v452_v6, 0  ;;  %v370_v19 = vld [vmem:[%s2682_s10 + $0x68] sm:$0xff] }
  0x1f   : > { %v444_v16 = vpack.c.bf16 %v420_v13, %v419_v12  ;;  %1416 = vperm.xlu1 %2502, %v1258_v2   ;;  %783 = vmatpush.bf16.xpose.msra.mxu1 %v692_v15  ;;  %v1023_v20 = vsel %vm952_vm1, %v396_v10, 0  ;;  %v385_v22 = vld [vmem:[%s2682_s10 + $0xe0] sm:$0xff]  ;;  %v386_v23 = vld [vmem:[%s2682_s10 + $0xe8] sm:$0xff]  ;;  %v395_v28 = vpack.c.bf16 %v370_v19, %v369_v18  ;;  %v689_v32 = vsel %vm597_vm0, %v451_v26, 0  ;;  %v431_v35 = vld [vmem:[%s2677_s28 + $0xd0] sm:$0xff] }
  0x20   : > { %v1047_v21 = vsel %vm952_vm1, %v404_v11, 0  ;;  %v417_v24 = vld [vmem:[%s2677_s28 + $0x60] sm:$0xff]  ;;  %1049 = vmatpush.bf16.xpose.msra.mxu2 %v1023_v20  ;;  %v418_v27 = vld [vmem:[%s2677_s28 + $0x68] sm:$0xff]  ;;  %v403_v29 = vpack.c.bf16 %v386_v23, %v385_v22  ;;  %v432_v36 = vld [vmem:[%s2677_s28 + $0xd8] sm:$0xff]  ;;  %1336 = vperm.xlu0 %2501, %v1242_v61  }
  0x21   : > { %1138 = vmatpush.bf16.xpose.msra.mxu3 %v1047_v21  ;;  %v668_v25 = vsel %vm597_vm0, %v444_v16, 0  ;;  %v443_v30 = vpack.c.bf16 %v418_v27, %v417_v24  ;;  %v1020_v33 = vsel %vm952_vm1, %v395_v28, 0  ;;  %v367_v37 = vld [vmem:[%s2682_s10 + $0x50] sm:$0xff]  ;;  %v368_v39 = vld [vmem:[%s2682_s10 + $0x58] sm:$0xff]  ;;  %v450_v44 = vpack.c.bf16 %v432_v36, %v431_v35  ;;  %v429_v52 = vld [vmem:[%s2677_s28 + $0xc0] sm:$0xff] }
  0x22   : > { %694 = vmatpush.bf16.xpose.msra.mxu0 %v668_v25  ;;  %v1044_v34 = vsel %vm952_vm1, %v403_v29, 0  ;;  %v383_v40 = vld [vmem:[%s2682_s10 + $0xd0] sm:$0xff]  ;;  %v384_v41 = vld [vmem:[%s2682_s10 + $0xd8] sm:$0xff]  ;;  %v394_v46 = vpack.c.bf16 %v368_v39, %v367_v37  ;;  %v430_v55 = vld [vmem:[%s2677_s28 + $0xc8] sm:$0xff] }
  0x23   : > { %v665_v38 = vsel %vm597_vm0, %v443_v30, 0  ;;  %v415_v42 = vld [vmem:[%s2677_s28 + $0x50] sm:$0xff]  ;;  %v416_v43 = vld [vmem:[%s2677_s28 + $0x58] sm:$0xff]  ;;  %v402_v47 = vpack.c.bf16 %v384_v41, %v383_v40  ;;  %v686_v51 = vsel %vm597_vm0, %v450_v44, 0  ;;  %v365_v56 = vld [vmem:[%s2682_s10 + $0x40] sm:$0xff]  ;;  %v449_v0 = vpack.c.bf16 %v430_v55, %v429_v52 }
  0x24   : > { %v442_v48 = vpack.c.bf16 %v416_v43, %v415_v42  ;;  %v1017_v53 = vsel %vm952_vm1, %v394_v46, 0  ;;  %v366_v57 = vld [vmem:[%s2682_s10 + $0x48] sm:$0xff]  ;;  %v381_v59 = vld [vmem:[%s2682_s10 + $0xc0] sm:$0xff]  ;;  %v427_v7 = vld [vmem:[%s2677_s28 + $0xb0] sm:$0xff] }
  0x25   : > { %v1041_v54 = vsel %vm952_vm1, %v402_v47, 0  ;;  %v382_v60 = vld [vmem:[%s2682_s10 + $0xc8] sm:$0xff]  ;;  %v413_v62 = vld [vmem:[%s2677_s28 + $0x40] sm:$0xff]  ;;  %v393_v1 = vpack.c.bf16 %v366_v57, %v365_v56  ;;  %v683_v6 = vsel %vm597_vm0, %v449_v0, 0  ;;  %v428_v10 = vld [vmem:[%s2677_s28 + $0xb8] sm:$0xff] }
  0x26   : > { %v662_v58 = vsel %vm597_vm0, %v442_v48, 0  ;;  %v414_v63 = vld [vmem:[%s2677_s28 + $0x48] sm:$0xff]  ;;  %v401_v2 = vpack.c.bf16 %v382_v60, %v381_v59  ;;  %v363_v11 = vld [vmem:[%s2682_s10 + $0x30] sm:$0xff]  ;;  %v364_v12 = vld [vmem:[%s2682_s10 + $0x38] sm:$0xff]  ;;  %v448_v19 = vpack.c.bf16 %v428_v10, %v427_v7 }
  0x27   : > { %1406 = vperm.xlu1 %2502, %v1256_v31   ;;  %784 = vmatpush.bf16.xpose.msra.mxu1 %v689_v32  ;;  %v1240_v3 = vld [vmem:[%s3534_s4 + $0x68] sm:$0xff]  ;;  %v441_v4 = vpack.c.bf16 %v414_v63, %v413_v62  ;;  %v1014_v8 = vsel %vm952_vm1, %v393_v1, 0  ;;  %v379_v14 = vld [vmem:[%s2682_s10 + $0xb0] sm:$0xff]  ;;  %v380_v15 = vld [vmem:[%s2682_s10 + $0xb8] sm:$0xff]  ;;  %v392_v20 = vpack.c.bf16 %v364_v12, %v363_v11 }
  0x28   : > { %1050 = vmatpush.bf16.xpose.msra.mxu2 %v1020_v33  ;;  %v1236_v5 = vld [vmem:[%s3534_s4 + $0x48] sm:$0xff]  ;;  %1326 = vperm.xlu2 %2503, %v1240_v3   ;;  %v1038_v9 = vsel %vm952_vm1, %v401_v2, 0  ;;  %v1255_v16 = vld [vmem:[%s3534_s4 + $0xe0] sm:$0xff]  ;;  %v411_v17 = vld [vmem:[%s2677_s28 + $0x30] sm:$0xff]  ;;  %v400_v21 = vpack.c.bf16 %v380_v15, %v379_v14  ;;  %v680_v25 = vsel %vm597_vm0, %v448_v19, 0 }
  0x29   : > { %1139 = vmatpush.bf16.xpose.msra.mxu3 %v1044_v34  ;;  %v659_v13 = vsel %vm597_vm0, %v441_v4, 0  ;;  %v412_v18 = vld [vmem:[%s2677_s28 + $0x38] sm:$0xff]  ;;  %1401 = vperm.xlu0 %2501, %v1255_v16   ;;  %v1237_v22 = vld [vmem:[%s3534_s4 + $0x50] sm:$0xff]  ;;  %v425_v26 = vld [vmem:[%s2677_s28 + $0xa0] sm:$0xff]  ;;  %v1011_v27 = vsel %vm952_vm1, %v392_v20, 0 }
  0x2a   : > { %695 = vmatpush.bf16.xpose.msra.mxu0 %v665_v38  ;;  %v440_v23 = vpack.c.bf16 %v412_v18, %v411_v17  ;;  %v1233_v24 = vld [vmem:[%s3534_s4 + $0x30] sm:$0xff]  ;;  %v1035_v28 = vsel %vm952_vm1, %v400_v21, 0  ;;  %v426_v29 = vld [vmem:[%s2677_s28 + $0xa8] sm:$0xff]  ;;  %v361_v30 = vld [vmem:[%s2682_s10 + $0x20] sm:$0xff] }
  0x2b   : > { %v362_v31 = vld [vmem:[%s2682_s10 + $0x28] sm:$0xff]  ;;  %v377_v33 = vld [vmem:[%s2682_s10 + $0xa0] sm:$0xff]  ;;  %v1238_v35 = vld [vmem:[%s3534_s4 + $0x58] sm:$0xff]  ;;  %v447_v38 = vpack.c.bf16 %v426_v29, %v425_v26 }
  0x2c   : > { %v656_v32 = vsel %vm597_vm0, %v440_v23, 0  ;;  %v378_v34 = vld [vmem:[%s2682_s10 + $0xa8] sm:$0xff]  ;;  %v409_v36 = vld [vmem:[%s2677_s28 + $0x20] sm:$0xff]  ;;  %v391_v39 = vpack.c.bf16 %v362_v31, %v361_v30  ;;  %v1254_v41 = vld [vmem:[%s3534_s4 + $0xd8] sm:$0xff] }
  0x2d   : > { %v410_v37 = vld [vmem:[%s2677_s28 + $0x28] sm:$0xff]  ;;  %v399_v40 = vpack.c.bf16 %v378_v34, %v377_v33  ;;  %v1250_v43 = vld [vmem:[%s3534_s4 + $0xb8] sm:$0xff]  ;;  %v677_v44 = vsel %vm597_vm0, %v447_v38, 0  ;;  %v423_v45 = vld [vmem:[%s2677_s28 + $0x90] sm:$0xff] }
  0x2e   : > { %v439_v42 = vpack.c.bf16 %v410_v37, %v409_v36  ;;  %v1008_v46 = vsel %vm952_vm1, %v391_v39, 0  ;;  %v424_v48 = vld [vmem:[%s2677_s28 + $0x98] sm:$0xff]  ;;  %v375_v52 = vld [vmem:[%s2682_s10 + $0x90] sm:$0xff]  ;;  %v1251_v60 = vld [vmem:[%s3534_s4 + $0xc0] sm:$0xff] }
  0x2f   : > { %1391 = vperm.xlu1 %2502, %v1253_v49   ;;  %785 = vmatpush.bf16.xpose.msra.mxu1 %v686_v51  ;;  %v1032_v47 = vsel %vm952_vm1, %v399_v40, 0  ;;  %v359_v49 = vld [vmem:[%s2682_s10 + $0x10] sm:$0xff]  ;;  %v360_v50 = vld [vmem:[%s2682_s10 + $0x18] sm:$0xff]  ;;  %v446_v57 = vpack.c.bf16 %v424_v48, %v423_v45  ;;  %v1247_v62 = vld [vmem:[%s3534_s4 + $0xa0] sm:$0xff] }
  0x30   : > { %1051 = vmatpush.bf16.xpose.msra.mxu2 %v1017_v53  ;;  %1311 = vperm.xlu2 %2503, %v1237_v22   ;;  %v653_v51 = vsel %vm597_vm0, %v439_v42, 0  ;;  %v376_v53 = vld [vmem:[%s2682_s10 + $0x98] sm:$0xff]  ;;  %v407_v55 = vld [vmem:[%s2677_s28 + $0x10] sm:$0xff]  ;;  %v421_v0 = vld [vmem:[%s2677_s28 + $0x80] sm:$0xff] }
  0x31   : > { %1140 = vmatpush.bf16.xpose.msra.mxu3 %v1041_v54  ;;  %1316 = vperm.xlu0 %2501, %v1238_v35   ;;  %v1235_v54 = vld [vmem:[%s3534_s4 + $0x40] sm:$0xff]  ;;  %v408_v56 = vld [vmem:[%s2677_s28 + $0x18] sm:$0xff]  ;;  %v398_v59 = vpack.c.bf16 %v376_v53, %v375_v52  ;;  %v674_v63 = vsel %vm597_vm0, %v446_v57, 0  ;;  %v422_v3 = vld [vmem:[%s2677_s28 + $0x88] sm:$0xff] }
  0x32   : > { %696 = vmatpush.bf16.xpose.msra.mxu0 %v662_v58  ;;  %v390_v58 = vpack.c.bf16 %v360_v50, %v359_v49  ;;  %v438_v61 = vpack.c.bf16 %v408_v56, %v407_v55  ;;  %v357_v4 = vld [vmem:[%s2682_s10] sm:$0xff]  ;;  %v406_v11 = vld [vmem:[%s2677_s28 + $0x8] sm:$0xff]  ;;  %v445_v12 = vpack.c.bf16 %v422_v3, %v421_v0  ;;  %v1234_v15 = vld [vmem:[%s3534_s4 + $0x38] sm:$0xff] }
  0x33   : > { %v1029_v2 = vsel %vm952_vm1, %v398_v59, 0  ;;  %v373_v7 = vld [vmem:[%s2682_s10 + $0x80] sm:$0xff]  ;;  %v1230_v17 = vld [vmem:[%s3534_s4 + $0x18] sm:$0xff]  ;;  %v1249_v22 = vld [vmem:[%s3534_s4 + $0xb0] sm:$0xff] }
  0x34   : > { %v1005_v1 = vsel %vm952_vm1, %v390_v58, 0  ;;  %v405_v10 = vld [vmem:[%s2677_s28] sm:$0xff]  ;;  %v671_v18 = vsel %vm597_vm0, %v445_v12, 0  ;;  %v1229_v29 = vld [vmem:[%s3534_s4 + $0x10] sm:$0xff]  ;;  %v2430_v31 = vld [vmem:[%s3533_s3 + $0x8] sm:$0xff] }
  0x35   : > { %v437_v16 = vpack.c.bf16 %v406_v11, %v405_v10  ;;  %v1231_v23 = vld [vmem:[%s3534_s4 + $0x20] sm:$0xff]  ;;  %v1245_v30 = vld [vmem:[%s3534_s4 + $0x90] sm:$0xff]  ;;  %v1228_v33 = vld [vmem:[%s3534_s4 + $0x8] sm:$0xff] }
  0x36   : > { %v1227_v26 = vld [vmem:[%s3534_s4] sm:$0xff]  ;;  %v2431_v34 = vld [vmem:[%s3533_s3 + $0x10] sm:$0xff]  ;;  %v2432_v36 = vld [vmem:[%s3533_s3 + $0x18] sm:$0xff] }
  0x37   : > { %1306 = vperm.xlu1 %2502, %v1236_v5   ;;  %786 = vmatpush.bf16.xpose.msra.mxu1 %v683_v6  ;;  %v358_v5 = vld [vmem:[%s2682_s10 + $0x8] sm:$0xff]  ;;  %v650_v6 = vsel %vm597_vm0, %v438_v61, 0  ;;  %v647_v21 = vsel %vm597_vm0, %v437_v16, 0  ;;  %v2415_v35 = vld [vmem:[%s3532_s2 + $0x10] sm:$0xff]  ;;  %v2416_v37 = vld [vmem:[%s3532_s2 + $0x18] sm:$0xff] }
  0x38   : > { %1052 = vmatpush.bf16.xpose.msra.mxu2 %v1014_v8  ;;  %1396 = vperm.xlu2 %2503, %v1254_v41   ;;  %v374_v8 = vld [vmem:[%s2682_s10 + $0x88] sm:$0xff]  ;;  %v2433_v42 = vld [vmem:[%s3533_s3 + $0x20] sm:$0xff]  ;;  %v2419_v55 = vld [vmem:[%s3532_s2 + $0x30] sm:$0xff]  ;;  %s2072_s10 = sshll.u32 %s2068_s18, 4  ;;  %s2073_s10 = int_to_ptr.hbm [resolvable:$true] %s2072_s10 }
  0x39   : > { %1141 = vmatpush.bf16.xpose.msra.mxu3 %v1038_v9  ;;  %1301 = vperm.xlu0 %2501, %v1235_v54   ;;  %v1252_v9 = vld [vmem:[%s3534_s4 + $0xc8] sm:$0xff]  ;;  %v397_v14 = vpack.c.bf16 %v374_v8, %v373_v7  ;;  %v2435_v54 = vld [vmem:[%s3533_s3 + $0x30] sm:$0xff]  ;;  %v2437_v7 = vld [vmem:[%s3533_s3 + $0x40] sm:$0xff]  ;;  %s2518_s24 = sshra.s32 %s2073_s10, 4  ;;  %s2519_s24 = int_to_ptr.hbm [resolvable:$true] %s2518_s24 }
  0x3a   : > { %697 = vmatpush.bf16.xpose.msra.mxu0 %v659_v13  ;;  %v389_v13 = vpack.c.bf16 %v358_v5, %v357_v4  ;;  %v2418_v48 = vld [vmem:[%s3532_s2 + $0x28] sm:$0xff]  ;;  %s2520_s28 = scalar_lea.hbm %s2519_s24, 2  ;;  %p2525_p0 = scmp.lt.s32.totalorder %s2519_s24, %s3539_s9 }
  0x3b   : > { %v1026_v20 = vsel %vm952_vm1, %v397_v14, 0  ;;  %v1244_v5 = vld [vmem:[%s3534_s4 + $0x88] sm:$0xff]  ;;  %p2521_p11 = scmp.ne.s32.totalorder %s2519_s24, %s2520_s28  ;;  %p2526_p1 = scmp.lt.s32.totalorder %s2524_s29, %s2520_s28 }
  0x3c   : > { %v1002_v19 = vsel %vm952_vm1, %v389_v13, 0 }
  0x3d   : > { %p2522_p12 = pnand %p2521_p11, %p2660_p5  ;;  %p2527_p2 = por %p2526_p1, %p2525_p0 }
  0x3f   : > { %1291 = vperm.xlu1 %2502, %v1233_v24   ;;  %787 = vmatpush.bf16.xpose.msra.mxu1 %v680_v25  ;;  %v2429_v24 = vld [vmem:[%s3533_s3] sm:$0xff]  ;;  %p2523_p13 = pneg %p2522_p12 }
  0x40   : > { %1053 = vmatpush.bf16.xpose.msra.mxu2 %v1011_v27  ;;  %1381 = vperm.xlu2 %2503, %v1251_v60   ;;  %v2413_v25 = vld [vmem:[%s3532_s2] sm:$0xff]  ;;  %v1232_v27 = vld [vmem:[%s3534_s4 + $0x28] sm:$0xff]  ;;  %v1246_v60 = vld [vmem:[%s3534_s4 + $0x98] sm:$0xff] }
  0x41   : > { %1142 = vmatpush.bf16.xpose.msra.mxu3 %v1035_v28  ;;  %1386 = vperm.xlu0 %2501, %v1252_v9   ;;  %v1248_v28 = vld [vmem:[%s3534_s4 + $0xa8] sm:$0xff]  ;;  %v2421_v9 = vld [vmem:[%s3532_s2 + $0x40] sm:$0xff]  ;;  %p2528_p3 = pnand %p2527_p2, %p2523_p13 }
  0x42   : > { %698 = vmatpush.bf16.xpose.msra.mxu0 %v656_v32  ;;  %v2414_v32 = vld [vmem:[%s3532_s2 + $0x8] sm:$0xff] }
  0x47   : > { %1376 = vperm.xlu1 %2502, %v1250_v43   ;;  %788 = vmatpush.bf16.xpose.msra.mxu1 %v677_v44  ;;  %v2417_v43 = vld [vmem:[%s3532_s2 + $0x20] sm:$0xff] }
  0x48   : > { %1054 = vmatpush.bf16.xpose.msra.mxu2 %v1008_v46  ;;  %1296 = vperm.xlu2 %2503, %v1234_v15  }
  0x49   : > { %1143 = vmatpush.bf16.xpose.msra.mxu3 %v1032_v47  ;;  %1371 = vperm.xlu0 %2501, %v1249_v22   ;;  %v2434_v47 = vld [vmem:[%s3533_s3 + $0x28] sm:$0xff] }
  0x4a   : > { %699 = vmatpush.bf16.xpose.msra.mxu0 %v653_v51 }
  0x4f   : > { %1361 = vperm.xlu1 %2502, %v1247_v62   ;;  %789 = vmatpush.bf16.xpose.msra.mxu1 %v674_v63  ;;  %v2436_v62 = vld [vmem:[%s3533_s3 + $0x38] sm:$0xff] }
  0x50   : > { %1055 = vmatpush.bf16.xpose.msra.mxu2 %v1005_v1  ;;  %1281 = vperm.xlu2 %2503, %v1231_v23   ;;  %v2420_v63 = vld [vmem:[%s3532_s2 + $0x38] sm:$0xff]  ;;  %v1243_v1 = vld [vmem:[%s3534_s4 + $0x80] sm:$0xff] }
  0x51   : > { %1144 = vmatpush.bf16.xpose.msra.mxu3 %v1029_v2  ;;  %1286 = vperm.xlu0 %2501, %v1232_v27  }
  0x52   : > { %700 = vmatpush.bf16.xpose.msra.mxu0 %v650_v6 }
  0x57   : > { %1276 = vperm.xlu1 %2502, %v1230_v17   ;;  %790 = vmatpush.bf16.xpose.msra.mxu1 %v671_v18 }
  0x58   : > { %1056 = vmatpush.bf16.xpose.msra.mxu2 %v1002_v19  ;;  %1366 = vperm.xlu2 %2503, %v1248_v28  }
  0x59   : > { %1145 = vmatpush.bf16.xpose.msra.mxu3 %v1026_v20  ;;  %1271 = vperm.xlu0 %2501, %v1229_v29  }
  0x5a   : > { %701 = vmatpush.bf16.xpose.msra.mxu0 %v647_v21 }
  0x5e   : > { %2233 = vmatmul.msk.bf16.vlgmr.msra.gmra.mxu1 %vm597_vm0, %v2429_v24 }
  0x5f   : > { %1261 = vperm.xlu1 %2502, %v1227_v26   ;;  %2313 = vmatmul.msk.bf16.vlgmr.msra.gmra.mxu2 %vm952_vm1, %v2413_v25 }
  0x60   : > { %2329 = vmatmul.msk.bf16.vlgmr.msra.gmra.mxu3 %vm952_vm1, %v2413_v25  ;;  %1351 = vperm.xlu2 %2503, %v1245_v30   ;;  %v2422_v30 = vld [vmem:[%s3532_s2 + $0x48] sm:$0xff] }
  0x61   : > { %2217 = vmatmul.msk.bf16.vlgmr.msra.gmra.mxu0 %vm597_vm0, %v2429_v24  ;;  %1356 = vperm.xlu0 %2501, %v1246_v60   ;;  %v2438_v24 = vld [vmem:[%s3533_s3 + $0x48] sm:$0xff] }
  0x67   : > { %1346 = vperm.xlu1 %2502, %v1244_v5   ;;  %v1607_v5 = vld [vmem:[%s3536_s6 + $0x60] sm:$0xff] }
  0x68   : > { %1266 = vperm.xlu2 %2503, %v1228_v33  }
  0x69   : > { %1341 = vperm.xlu0 %2501, %v1243_v1   ;;  %v1610_v1 = vld [vmem:[%s3536_s6 + $0x78] sm:$0xff] }
  0x6e   : > { %2234 = vmatmul.msk.bf16.gmra.mxu1 %vm597_vm0, %v2430_v31 }
  0x6f   : > { %2314 = vmatmul.msk.bf16.gmra.mxu2 %vm952_vm1, %v2414_v32  ;;  %1673 = vperm.xlu1 %2502, %v1607_v5  }
  0x70   : > { %2330 = vmatmul.msk.bf16.gmra.mxu3 %vm952_vm1, %v2414_v32 }
  0x71   : > { %2218 = vmatmul.msk.bf16.gmra.mxu0 %vm597_vm0, %v2430_v31  ;;  %1688 = vperm.xlu0 %2501, %v1610_v1  }
  0x72   : > { %v2905_v39 = vpop.permute.xlu2 %1321 }
  0x7e   : > { %2235 = vmatmul.msk.bf16.gmra.mxu1 %vm597_vm0, %v2431_v34 }
  0x7f   : > { %2315 = vmatmul.msk.bf16.gmra.mxu2 %vm952_vm1, %v2415_v35 }
  0x80   : > { %2331 = vmatmul.msk.bf16.gmra.mxu3 %vm952_vm1, %v2415_v35 }
  0x81   : > { %2219 = vmatmul.msk.bf16.gmra.mxu0 %vm597_vm0, %v2431_v34 }
  0x82   : > { %v2910_v41 = vpop.permute.xlu2 %1326 }
  0x89   : > { %v2901_v38 = vpop.permute.xlu1 %1411 }
  0x8a   : > { %v2924_v45 = vpop.permute.xlu2 %1311  ;;  %v2926_v46 = vpop.permute.xlu0 %1331 }
  0x8e   : > { %2236 = vmatmul.msk.bf16.gmra.mxu1 %vm597_vm0, %v2432_v36 }
  0x8f   : > { %2316 = vmatmul.msk.bf16.gmra.mxu2 %vm952_vm1, %v2416_v37 }
  0x90   : > { %2332 = vmatmul.msk.bf16.gmra.mxu3 %vm952_vm1, %v2416_v37 }
  0x91   : > { %2220 = vmatmul.msk.bf16.gmra.mxu0 %vm597_vm0, %v2432_v36  ;;  %v2908_v40 = vpop.permute.xlu1 %1416 }
  0x92   : > { %v2936_v50 = vpop.permute.xlu2 %1396  ;;  %v2942_v51 = vpop.permute.xlu0 %1336 }
  0x93   : > { %3552 = vst [vmem:[#allocation7_spill] sm:$0xff] %v2936_v50 }
  0x99   : > { %v2922_v44 = vpop.permute.xlu1 %1406 }
  0x9a   : > { %v2946_v53 = vpop.permute.xlu2 %1381 }
  0x9b   : > { %3553 = vst [vmem:[#allocation8_spill] sm:$0xff] %v2946_v53  ;;  %v2954_v56 = vpop.permute.xlu0 %1401 }
  0x9e   : > { %2237 = vmatmul.msk.bf16.gmra.mxu1 %vm597_vm0, %v2433_v42 }
  0x9f   : > { %2317 = vmatmul.msk.bf16.gmra.mxu2 %vm952_vm1, %v2417_v43 }
  0xa0   : > { %2333 = vmatmul.msk.bf16.gmra.mxu3 %vm952_vm1, %v2417_v43 }
  0xa1   : > { %2221 = vmatmul.msk.bf16.gmra.mxu0 %vm597_vm0, %v2433_v42  ;;  %v2934_v49 = vpop.permute.xlu1 %1391 }
  0xa2   : > { %3551 = vst [vmem:[#allocation6_spill] sm:$0xff] %v2934_v49  ;;  %v2962_v58 = vpop.permute.xlu2 %1296 }
  0xa3   : > { %v2964_v59 = vpop.permute.xlu0 %1316 }
  0xa9   : > { %v2944_v52 = vpop.permute.xlu1 %1306 }
  0xaa   : > { %v2977_v0 = vpop.permute.xlu2 %1281 }
  0xab   : > { %v2986_v2 = vpop.permute.xlu0 %1301 }
  0xae   : > { %2238 = vmatmul.msk.bf16.gmra.mxu1 %vm597_vm0, %v2434_v47 }
  0xaf   : > { %2318 = vmatmul.msk.bf16.gmra.mxu2 %vm952_vm1, %v2418_v48 }
  0xb0   : > { %2334 = vmatmul.msk.bf16.gmra.mxu3 %vm952_vm1, %v2418_v48 }
  0xb1   : > { %2222 = vmatmul.msk.bf16.gmra.mxu0 %vm597_vm0, %v2434_v47  ;;  %v2960_v57 = vpop.permute.xlu1 %1291 }
  0xb2   : > { %v2990_v4 = vpop.permute.xlu2 %1366 }
  0xb3   : > { %3556 = vst [vmem:[#allocation11_spill] sm:$0xff] %v2990_v4  ;;  %v2995_v6 = vpop.permute.xlu0 %1386 }
  0xb4   : > { %3557 = vst [vmem:[#allocation12_spill] sm:$0xff] %v2995_v6 }
  0xb9   : > { %v2969_v61 = vpop.permute.xlu1 %1376 }
  0xba   : > { %3554 = vst [vmem:[#allocation9_spill] sm:$0xff] %v2969_v61  ;;  %v3006_v12 = vpop.permute.xlu2 %1351 }
  0xbb   : > { %3558 = vst [vmem:[#allocation13_spill] sm:$0xff] %v3006_v12  ;;  %v3009_v18 = vpop.permute.xlu0 %1371 }
  0xbc   : > { %3559 = vst [vmem:[#allocation14_spill] sm:$0xff] %v3009_v18 }
  0xbe   : > { %2239 = vmatmul.msk.bf16.gmra.mxu1 %vm597_vm0, %v2435_v54 }
  0xbf   : > { %2319 = vmatmul.msk.bf16.gmra.mxu2 %vm952_vm1, %v2419_v55 }
  0xc0   : > { %2335 = vmatmul.msk.bf16.gmra.mxu3 %vm952_vm1, %v2419_v55 }
  0xc1   : > { %2223 = vmatmul.msk.bf16.gmra.mxu0 %vm597_vm0, %v2435_v54  ;;  %v2988_v3 = vpop.permute.xlu1 %1361 }
  0xc2   : > { %3555 = vst [vmem:[#allocation10_spill] sm:$0xff] %v2988_v3  ;;  %v1267_v21 = vpop.permute.xlu2 %1266 }
  0xc3   : > { %v3017_v34 = vpop.permute.xlu0 %1286 }
  0xc9   : > { %v1277_v11 = vpop.permute.xlu1 %1276 }
  0xce   : > { %2240 = vmatmul.msk.bf16.gmra.mxu1 %vm597_vm0, %v2436_v62 }
  0xcf   : > { %2320 = vmatmul.msk.bf16.gmra.mxu2 %vm952_vm1, %v2420_v63 }
  0xd0   : > { %2336 = vmatmul.msk.bf16.gmra.mxu3 %vm952_vm1, %v2420_v63 }
  0xd1   : > { %2224 = vmatmul.msk.bf16.gmra.mxu0 %vm597_vm0, %v2436_v62  ;;  %v1262_v20 = vpop.permute.xlu1 %1261 }
  0xdb   : > { %v792_v8 = vpop.f32.mrf.mxu1 }
  0xde   : > { %v703_v10 = vpop.f32.mrf.mxu0  ;;  %2241 = vmatmul.msk.bf16.gmra.mxu1 %vm597_vm0, %v2437_v7 }
  0xdf   : > { %2321 = vmatmul.msk.bf16.gmra.mxu2 %vm952_vm1, %v2421_v9 }
  0xe0   : > { %2337 = vmatmul.msk.bf16.gmra.mxu3 %vm952_vm1, %v2421_v9 }
  0xe1   : > { %2225 = vmatmul.msk.bf16.gmra.mxu0 %vm597_vm0, %v2437_v7  ;;  %v1272_v7 = vpop.permute.xlu0 %1271 }
  0xe2   : > { %v1058_v13 = vpop.f32.mrf.mxu2 }
  0xe3   : > { %v1147_v14 = vpop.f32.mrf.mxu3  ;;  %v1059_v15 = vadd.f32 %v1058_v13, %v703_v10  ;;  %v794_v17 = vpop.f32.mrf.mxu1  ;;  %v2439_v10 = vld [vmem:[%s3533_s3 + $0x50] sm:$0xff] }
  0xe4   : > { %v1148_v16 = vadd.f32 %v1147_v14, %v792_v8 }
  0xe5   : > { %v1419_v25 = vadd.f32 %v1262_v20, %v1059_v15 }
  0xe6   : > { %v705_v19 = vpop.f32.mrf.mxu0  ;;  %v1420_v26 = vadd.f32 %v1262_v20, %v1148_v16 }
  0xe7   : > { %v1483_v35 = vmax.f32 %v1419_v25, 0.0 }
  0xe8   : > { %v1484_v36 = vmax.f32 %v1420_v26, 0.0 }
  0xea   : > { %v1060_v22 = vpop.f32.mrf.mxu2 }
  0xeb   : > { %v1149_v23 = vpop.f32.mrf.mxu3  ;;  %v1061_v27 = vadd.f32 %v1060_v22, %v705_v19  ;;  %v797_v29 = vpop.f32.mrf.mxu1  ;;  %v2423_v19 = vld [vmem:[%s3532_s2 + $0x50] sm:$0xff] }
  0xec   : > { %v1150_v28 = vadd.f32 %v1149_v23, %v794_v17  ;;  %v1605_v23 = vld [vmem:[%s3536_s6 + $0x50] sm:$0xff] }
  0xed   : > { %v1421_v31 = vadd.f32 %v1267_v21, %v1061_v27  ;;  %1663 = vperm.xlu0 %2501, %v1605_v23  }
  0xee   : > { %v1422_v32 = vadd.f32 %v1267_v21, %v1150_v28  ;;  %v708_v33 = vpop.f32.mrf.mxu0  ;;  %2242 = vmatmul.msk.bf16.gmra.mxu1 %vm597_vm0, %v2438_v24 }
  0xef   : > { %v1485_v37 = vmax.f32 %v1421_v31, 0.0  ;;  %2322 = vmatmul.msk.bf16.gmra.mxu2 %vm952_vm1, %v2422_v30 }
  0xf0   : > { %v1486_v42 = vmax.f32 %v1422_v32, 0.0  ;;  %2338 = vmatmul.msk.bf16.gmra.mxu3 %vm952_vm1, %v2422_v30 }
  0xf1   : > { %2226 = vmatmul.msk.bf16.gmra.mxu0 %vm597_vm0, %v2438_v24  ;;  %v3023_v43 = vpack.c.bf16 %v1485_v37, %v1483_v35  ;;  %v1606_v24 = vld [vmem:[%s3536_s6 + $0x58] sm:$0xff]  ;;  %v1604_v37 = vld [vmem:[%s3536_s6 + $0x48] sm:$0xff] }
  0xf2   : > { %v3025_v47 = vpack.c.bf16 %v1486_v42, %v1484_v36  ;;  %v1063_v48 = vpop.f32.mrf.mxu2  ;;  %1668 = vperm.xlu1 %2502, %v1606_v24   ;;  %v1601_v42 = vld [vmem:[%s3536_s6 + $0x30] sm:$0xff] }
  0xf3   : > { %v1152_v54 = vpop.f32.mrf.mxu3  ;;  %v1064_v55 = vadd.f32 %v1063_v48, %v708_v33  ;;  %v799_v62 = vpop.f32.mrf.mxu1 }
  0xf4   : > { %v1153_v60 = vadd.f32 %v1152_v54, %v797_v29 }
  0xf5   : > { %v1423_v13 = vadd.f32 %v1272_v7, %v1064_v55  ;;  %1658 = vperm.xlu0 %2501, %v1604_v37   ;;  %v2440_v55 = vld [vmem:[%s3533_s3 + $0x58] sm:$0xff] }
  0xf6   : > { %v710_v63 = vpop.f32.mrf.mxu0  ;;  %v1424_v14 = vadd.f32 %v1272_v7, %v1153_v60  ;;  %v2424_v7 = vld [vmem:[%s3532_s2 + $0x58] sm:$0xff] }
  0xf7   : > { %v1487_v25 = vmax.f32 %v1423_v13, 0.0 }
  0xf8   : > { %v1488_v26 = vmax.f32 %v1424_v14, 0.0  ;;  %v1600_v14 = vld [vmem:[%s3536_s6 + $0x28] sm:$0xff] }
  0xfa   : > { %v1065_v8 = vpop.f32.mrf.mxu2  ;;  %1643 = vperm.xlu1 %2502, %v1601_v42  }
  0xfb   : > { %v1154_v9 = vpop.f32.mrf.mxu3  ;;  %v1066_v15 = vadd.f32 %v1065_v8, %v710_v63  ;;  %v802_v17 = vpop.f32.mrf.mxu1  ;;  %v1609_v8 = vld [vmem:[%s3536_s6 + $0x70] sm:$0xff] }
  0xfc   : > { %v1155_v16 = vadd.f32 %v1154_v9, %v799_v62  ;;  %1683 = vperm.xlu2 %2503, %v1609_v8  }
  0xfd   : > { %v1425_v20 = vadd.f32 %v1277_v11, %v1066_v15 }
  0xfe   : > { %v1426_v21 = vadd.f32 %v1277_v11, %v1155_v16  ;;  %v713_v22 = vpop.f32.mrf.mxu0  ;;  %2243 = vmatmul.msk.bf16.gmra.mxu1 %vm597_vm0, %v2439_v10 }
  0xff   : > { %2323 = vmatmul.msk.bf16.gmra.mxu2 %vm952_vm1, %v2423_v19  ;;  %v1489_v27 = vmax.f32 %v1425_v20, 0.0 }
 0x100   : > { %2339 = vmatmul.msk.bf16.gmra.mxu3 %vm952_vm1, %v2423_v19  ;;  %v1490_v11 = vmax.f32 %v1426_v21, 0.0 }
 0x101   : > { %2227 = vmatmul.msk.bf16.gmra.mxu0 %vm597_vm0, %v2439_v10  ;;  %v3049_v28 = vpack.c.bf16 %v1489_v27, %v1487_v25 }
 0x102   : > { %v3051_v29 = vpack.c.bf16 %v1490_v11, %v1488_v26  ;;  %v1068_v30 = vpop.f32.mrf.mxu2  ;;  %1638 = vperm.xlu1 %2502, %v1600_v14   ;;  %v1608_v26 = vld [vmem:[%s3536_s6 + $0x68] sm:$0xff]  ;;  %v1598_v11 = vld [vmem:[%s3536_s6 + $0x18] sm:$0xff] }
 0x103   : > { %v1157_v31 = vpop.f32.mrf.mxu3  ;;  %v1069_v32 = vadd.f32 %v1068_v30, %v713_v22  ;;  %v804_v35 = vpop.f32.mrf.mxu1  ;;  %v1595_v30 = vld [vmem:[%s3536_s6] sm:$0xff] }
 0x104   : > { %v1158_v33 = vadd.f32 %v1157_v31, %v802_v17  ;;  %1678 = vperm.xlu2 %2503, %v1608_v26  }
 0x105   : > { %v1427_v60 = vadd.f32 %v2977_v0, %v1069_v32 }
 0x106   : > { %v715_v36 = vpop.f32.mrf.mxu0  ;;  %v1428_v62 = vadd.f32 %v2977_v0, %v1158_v33  ;;  %v1599_v0 = vld [vmem:[%s3536_s6 + $0x20] sm:$0xff] }
 0x107   : > { %1633 = vperm.xlu0 %2501, %v1599_v0   ;;  %v1491_v15 = vmax.f32 %v1427_v60, 0.0  ;;  %v2441_v33 = vld [vmem:[%s3533_s3 + $0x60] sm:$0xff] }
 0x108   : > { %v1492_v16 = vmax.f32 %v1428_v62, 0.0 }
 0x10a   : > { %v1070_v48 = vpop.f32.mrf.mxu2  ;;  %1613 = vperm.xlu1 %2502, %v1595_v30   ;;  %v1596_v30 = vld [vmem:[%s3536_s6 + $0x8] sm:$0xff] }
 0x10b   : > { %v1159_v54 = vpop.f32.mrf.mxu3  ;;  %v1071_v63 = vadd.f32 %v1070_v48, %v715_v36  ;;  %v807_v5 = vpop.f32.mrf.mxu1 }
 0x10c   : > { %v1160_v1 = vadd.f32 %v1159_v54, %v804_v35  ;;  %v2425_v54 = vld [vmem:[%s3532_s2 + $0x60] sm:$0xff] }
 0x10d   : > { %v1429_v9 = vadd.f32 %v3017_v34, %v1071_v63 }
 0x10e   : > { %v1430_v10 = vadd.f32 %v3017_v34, %v1160_v1  ;;  %v718_v13 = vpop.f32.mrf.mxu0  ;;  %2244 = vmatmul.msk.bf16.gmra.mxu1 %vm597_vm0, %v2440_v55 }
 0x10f   : > { %2324 = vmatmul.msk.bf16.gmra.mxu2 %vm952_vm1, %v2424_v7  ;;  %v1493_v17 = vmax.f32 %v1429_v9, 0.0  ;;  %1628 = vperm.xlu0 %2501, %v1598_v11  }
 0x110   : > { %2340 = vmatmul.msk.bf16.gmra.mxu3 %vm952_vm1, %v2424_v7  ;;  %v1494_v34 = vmax.f32 %v1430_v10, 0.0 }
 0x111   : > { %2228 = vmatmul.msk.bf16.gmra.mxu0 %vm597_vm0, %v2440_v55  ;;  %v3082_v19 = vpack.c.bf16 %v1493_v17, %v1491_v15  ;;  %v1603_v55 = vld [vmem:[%s3536_s6 + $0x40] sm:$0xff]  ;;  %v1602_v15 = vld [vmem:[%s3536_s6 + $0x38] sm:$0xff] }
 0x112   : > { %v3084_v20 = vpack.c.bf16 %v1494_v34, %v1492_v16  ;;  %v1073_v21 = vpop.f32.mrf.mxu2  ;;  %1653 = vperm.xlu2 %2503, %v1603_v55  }
 0x113   : > { %v1162_v22 = vpop.f32.mrf.mxu3  ;;  %v1074_v23 = vadd.f32 %v1073_v21, %v718_v13  ;;  %v809_v25 = vpop.f32.mrf.mxu1  ;;  %v2442_v21 = vld [vmem:[%s3533_s3 + $0x68] sm:$0xff] }
 0x114   : > { %v1163_v24 = vadd.f32 %v1162_v22, %v807_v5 }
 0x115   : > { %v1431_v35 = vadd.f32 %v2960_v57, %v1074_v23  ;;  %v2426_v23 = vld [vmem:[%s3532_s2 + $0x68] sm:$0xff] }
 0x116   : > { %v720_v27 = vpop.f32.mrf.mxu0  ;;  %v1432_v36 = vadd.f32 %v2960_v57, %v1163_v24  ;;  %v1597_v24 = vld [vmem:[%s3536_s6 + $0x10] sm:$0xff] }
 0x117   : > { %v1495_v57 = vmax.f32 %v1431_v35, 0.0  ;;  %v2443_v35 = vld [vmem:[%s3533_s3 + $0x70] sm:$0xff] }
 0x118   : > { %v1496_v1 = vmax.f32 %v1432_v36, 0.0 }
 0x11a   : > { %v1075_v31 = vpop.f32.mrf.mxu2  ;;  %1648 = vperm.xlu2 %2503, %v1602_v15  }
 0x11b   : > { %v1164_v32 = vpop.f32.mrf.mxu3  ;;  %v1076_v37 = vadd.f32 %v1075_v31, %v720_v27  ;;  %v812_v48 = vpop.f32.mrf.mxu1 }
 0x11c   : > { %v1165_v42 = vadd.f32 %v1164_v32, %v809_v25 }
 0x11d   : > { %v1433_v60 = vadd.f32 %v2962_v58, %v1076_v37  ;;  %v2427_v37 = vld [vmem:[%s3532_s2 + $0x70] sm:$0xff] }
 0x11e   : > { %v1434_v62 = vadd.f32 %v2962_v58, %v1165_v42  ;;  %v723_v63 = vpop.f32.mrf.mxu0  ;;  %2245 = vmatmul.msk.bf16.gmra.mxu1 %vm597_vm0, %v2441_v33 }
 0x11f   : > { %2325 = vmatmul.msk.bf16.gmra.mxu2 %vm952_vm1, %v2425_v54  ;;  %v1497_v5 = vmax.f32 %v1433_v60, 0.0 }
 0x120   : > { %2341 = vmatmul.msk.bf16.gmra.mxu3 %vm952_vm1, %v2425_v54  ;;  %v1498_v7 = vmax.f32 %v1434_v62, 0.0 }
 0x121   : > { %2229 = vmatmul.msk.bf16.gmra.mxu0 %vm597_vm0, %v2441_v33  ;;  %v3112_v8 = vpack.c.bf16 %v1497_v5, %v1495_v57  ;;  %v2444_v57 = vld [vmem:[%s3533_s3 + $0x78] sm:$0xff] }
 0x122   : > { %v3114_v9 = vpack.c.bf16 %v1498_v7, %v1496_v1  ;;  %v1078_v10 = vpop.f32.mrf.mxu2  ;;  %1623 = vperm.xlu2 %2503, %v1597_v24   ;;  %v2428_v5 = vld [vmem:[%s3532_s2 + $0x78] sm:$0xff] }
 0x123   : > { %v1167_v13 = vpop.f32.mrf.mxu3  ;;  %v3116_v58 = vadd.f32 %v1078_v10, %v723_v63  ;;  %v3120_v14 = vpop.f32.mrf.mxu1 }
 0x124   : > { %v3118_v0 = vadd.f32 %v1167_v13, %v812_v48 }
 0x126   : > { %v3125_v16 = vpop.f32.mrf.mxu0 }
 0x12a   : > { %v3127_v17 = vpop.f32.mrf.mxu2  ;;  %1618 = vperm.xlu2 %2503, %v1596_v30  }
 0x12b   : > { %v3129_v34 = vpop.f32.mrf.mxu3  ;;  %v3134_v22 = vpop.f32.mrf.mxu1 }
 0x12e   : > { %v728_v25 = vpop.f32.mrf.mxu0  ;;  %2246 = vmatmul.msk.bf16.gmra.mxu1 %vm597_vm0, %v2442_v21 }
 0x12f   : > { %2326 = vmatmul.msk.bf16.gmra.mxu2 %vm952_vm1, %v2426_v23 }
 0x130   : > { %2342 = vmatmul.msk.bf16.gmra.mxu3 %vm952_vm1, %v2426_v23 }
 0x131   : > { %2230 = vmatmul.msk.bf16.gmra.mxu0 %vm597_vm0, %v2442_v21 }
 0x132   : > { %v1083_v26 = vpop.f32.mrf.mxu2 }
 0x133   : > { %v1172_v27 = vpop.f32.mrf.mxu3  ;;  %v819_v11 = vpop.f32.mrf.mxu1 }
 0x136   : > { %v730_v31 = vpop.f32.mrf.mxu0 }
 0x13a   : > { %v1085_v32 = vpop.f32.mrf.mxu2 }
 0x13b   : > { %v1174_v33 = vpop.f32.mrf.mxu3  ;;  %v822_v36 = vpop.f32.mrf.mxu1 }
 0x13c   : > { %v1175_v49 = vadd.f32 %v1174_v33, %v819_v11 }
 0x13e   : > { %v733_v42 = vpop.f32.mrf.mxu0  ;;  %2247 = vmatmul.msk.bf16.gmra.mxu1 %vm597_vm0, %v2443_v35 }
 0x13f   : > { %2327 = vmatmul.msk.bf16.gmra.mxu2 %vm952_vm1, %v2427_v37 }
 0x140   : > { %2343 = vmatmul.msk.bf16.gmra.mxu3 %vm952_vm1, %v2427_v37 }
 0x141   : > { %2231 = vmatmul.msk.bf16.gmra.mxu0 %vm597_vm0, %v2443_v35 }
 0x142   : > { %v1088_v48 = vpop.f32.mrf.mxu2 }
 0x143   : > { %v1177_v54 = vpop.f32.mrf.mxu3  ;;  %v824_v55 = vpop.f32.mrf.mxu1  ;;  %v1089_v37 = vadd.f32 %v1088_v48, %v733_v42  ;;  %v1084_v48 = vadd.f32 %v1083_v26, %v728_v25 }
 0x144   : > { %v1178_v12 = vadd.f32 %v1177_v54, %v822_v36  ;;  %v1173_v54 = vadd.f32 %v1172_v27, %v3134_v22 }
 0x146   : > { %v735_v60 = vpop.f32.mrf.mxu0 }
 0x14a   : > { %v1090_v62 = vpop.f32.mrf.mxu2 }
 0x14b   : > { %v1179_v63 = vpop.f32.mrf.mxu3  ;;  %v827_v1 = vpop.f32.mrf.mxu1  ;;  %v1091_v30 = vadd.f32 %v1090_v62, %v735_v60 }
 0x14c   : > { %v1180_v35 = vadd.f32 %v1179_v63, %v824_v55  ;;  %v1443_v55 = vadd.f32 %v2905_v39, %v1089_v37 }
 0x14d   : > { %v1445_v50 = vadd.f32 %v2910_v41, %v1091_v30 }
 0x14e   : > { %v738_v7 = vpop.f32.mrf.mxu0  ;;  %2248 = vmatmul.msk.bf16.gmra.mxu1 %vm597_vm0, %v2444_v57  ;;  %v1507_v33 = vmax.f32 %v1443_v55, 0.0 }
 0x14f   : > { %2328 = vmatmul.msk.bf16.gmra.mxu2 %vm952_vm1, %v2428_v5  ;;  %v1509_v26 = vmax.f32 %v1445_v50, 0.0 }
 0x150   : > { %2344 = vmatmul.msk.bf16.gmra.mxu3 %vm952_vm1, %v2428_v5 }
 0x151   : > { %2232 = vmatmul.msk.bf16.gmra.mxu0 %vm597_vm0, %v2444_v57  ;;  %v1086_v57 = vadd.f32 %v1085_v32, %v730_v31  ;;  %v1081_v32 = vadd.f32 %v3127_v17, %v3125_v16 }
 0x152   : > { %v1093_v10 = vpop.f32.mrf.mxu2 }
 0x153   : > { %v1182_v13 = vpop.f32.mrf.mxu3  ;;  %v829_v15 = vpop.f32.mrf.mxu1  ;;  %v1094_v23 = vadd.f32 %v1093_v10, %v738_v7  ;;  %v1446_v7 = vadd.f32 %v2910_v41, %v1180_v35  ;;  %v1170_v41 = vadd.f32 %v3129_v34, %v3120_v14  ;;  %v1435_v10 = vadd.f32 %v2986_v2, %v3116_v58 }
 0x154   : > { %v1183_v24 = vadd.f32 %v1182_v13, %v827_v1 }
 0x155   : > { %v1447_v18 = vadd.f32 %v2926_v46, %v1094_v23  ;;  %v1510_v27 = vmax.f32 %v1446_v7, 0.0  ;;  %v1438_v50 = vadd.f32 %v2944_v52, %v1170_v41  ;;  %v1499_v37 = vmax.f32 %v1435_v10, 0.0 }
 0x156   : > { %v740_v21 = vpop.f32.mrf.mxu0  ;;  %v1448_v61 = vadd.f32 %v2926_v46, %v1183_v24  ;;  %v1444_v46 = vadd.f32 %v2905_v39, %v1178_v12  ;;  %v1439_v39 = vadd.f32 %v2924_v45, %v1084_v48 }
 0x158   : > { %v1508_v62 = vmax.f32 %v1444_v46, 0.0  ;;  %v1503_v13 = vmax.f32 %v1439_v39, 0.0 }
 0x15a   : > { %v1095_v3 = vpop.f32.mrf.mxu2  ;;  %v1576_v34 = vpack.c.bf16 %v1510_v27, %v1508_v62 }
 0x15b   : > { %v1184_v4 = vpop.f32.mrf.mxu3  ;;  %v1096_v53 = vadd.f32 %v1095_v3, %v740_v21  ;;  %v832_v6 = vpop.f32.mrf.mxu1  ;;  %v1511_v3 = vmax.f32 %v1447_v18, 0.0 }
 0x15c   : > { %v1185_v5 = vadd.f32 %v1184_v4, %v829_v15  ;;  %v1512_v4 = vmax.f32 %v1448_v61, 0.0  ;;  %v1440_v61 = vadd.f32 %v2924_v45, %v1173_v54 }
 0x15d   : > { %v1449_v60 = vadd.f32 %v2942_v51, %v1096_v53  ;;  %v1442_v53 = vadd.f32 %v2964_v59, %v1175_v49  ;;  %v1437_v49 = vadd.f32 %v2944_v52, %v1081_v32  ;;  %v1502_v52 = vmax.f32 %v1438_v50, 0.0  ;;  %v2363_v50 = vld [vmem:[%s3535_s5 + $0x20] sm:$0xf] }
 0x15e   : > { %v1450_v42 = vadd.f32 %v2942_v51, %v1185_v5  ;;  %v743_v36 = vpop.f32.mrf.mxu0  ;;  %v1441_v51 = vadd.f32 %v2964_v59, %v1086_v57  ;;  %v1575_v59 = vpack.c.bf16 %v1509_v26, %v1507_v33  ;;  %v1504_v15 = vmax.f32 %v1440_v61, 0.0 }
 0x15f   : > { %v1513_v31 = vmax.f32 %v1449_v60, 0.0  ;;  %v1506_v1 = vmax.f32 %v1442_v53, 0.0  ;;  %v1501_v24 = vmax.f32 %v1437_v49, 0.0 }
 0x160   : > { %v1514_v11 = vmax.f32 %v1450_v42, 0.0  ;;  %v1505_v45 = vmax.f32 %v1441_v51, 0.0 }
 0x161   : > { %v1577_v25 = vpack.c.bf16 %v1513_v31, %v1511_v3  ;;  %v1574_v23 = vpack.c.bf16 %v1506_v1, %v1504_v15  ;;  %v1571_v57 = vpack.c.bf16 %v1501_v24, %v1499_v37  ;;  %v2371_v37 = vld [vmem:[%s3535_s5 + $0x30] sm:$0xf] }
 0x162   : > { %v1578_v22 = vpack.c.bf16 %v1514_v11, %v1512_v4  ;;  %v1098_v12 = vpop.f32.mrf.mxu2  ;;  %v1573_v21 = vpack.c.bf16 %v1505_v45, %v1503_v13 }
 0x163   : > { %v1187_v18 = vpop.f32.mrf.mxu3  ;;  %v3186_v16 = vadd.f32 %v1098_v12, %v743_v36  ;;  %1771 = vmatpush.bf16.msrb.mxu0 %v1577_v25  ;;  %v3190_v14 = vpop.f32.mrf.mxu1 }
 0x164   : > { %v3188_v17 = vadd.f32 %v1187_v18, %v832_v6  ;;  %1869 = vmatpush.bf16.msrb.mxu2 %v1578_v22  ;;  %v1436_v6 = vadd.f32 %v2986_v2, %v3118_v0 }
 0x165   : > { %3560 = vst [vmem:[#allocation15_spill] sm:$0xff] %v3186_v16 }
 0x166   : > { %3561 = vst [vmem:[#allocation16_spill] sm:$0xff] %v3188_v17  ;;  %v3194_v63 = vpop.f32.mrf.mxu0  ;;  %v1500_v5 = vmax.f32 %v1436_v6, 0.0 }
 0x167   : > { %1772 = vmatpush.bf16.msrb.mxu0 %v1575_v59  ;;  %v2450_v59 = vld [vmem:[%s3535_s5 + $0x24] sm:$0xf0] }
 0x168   : > { %1870 = vmatpush.bf16.msrb.mxu2 %v1576_v34  ;;  %v1572_v7 = vpack.c.bf16 %v1502_v52, %v1500_v5  ;;  %v2364_v45 = vor.u32 %v2450_v59, %v2363_v50  ;;  %v2452_v5 = vld [vmem:[%s3535_s5 + $0x34] sm:$0xf0] }
 0x16a   : > { %v3200_v30 = vpop.f32.mrf.mxu2 }
 0x16b   : > { %v3202_v35 = vpop.f32.mrf.mxu3  ;;  %1773 = vmatpush.bf16.msrb.mxu0 %v1573_v21  ;;  %v837_v58 = vpop.f32.mrf.mxu1 }
 0x16c   : > { %3562 = vst [vmem:[#allocation17_spill] sm:$0xff] %v3202_v35  ;;  %1871 = vmatpush.bf16.msrb.mxu2 %v1574_v23 }
 0x16e   : > { %v748_v2 = vpop.f32.mrf.mxu0 }
 0x16f   : > { %1774 = vmatpush.bf16.msrb.mxu0 %v1571_v57  ;;  %v2372_v57 = vor.u32 %v2452_v5, %v2371_v37 }
 0x170   : > { %1872 = vmatpush.bf16.msrb.mxu2 %v1572_v7 }
 0x172   : > { %v1103_v0 = vpop.f32.mrf.mxu2 }
 0x173   : > { %v1192_v60 = vpop.f32.mrf.mxu3  ;;  %v3204_v42 = vadd.f32 %v1103_v0, %v748_v2  ;;  %1775 = vmatpush.bf16.msrb.mxu0 %v3112_v8  ;;  %v3210_v48 = vpop.f32.mrf.mxu1  ;;  %v2347_v8 = vld [vmem:[%s3535_s5] sm:$0xf] }
 0x174   : > { %v3206_v36 = vadd.f32 %v1192_v60, %v837_v58  ;;  %1873 = vmatpush.bf16.msrb.mxu2 %v3114_v9  ;;  %v2446_v9 = vld [vmem:[%s3535_s5 + $0x4] sm:$0xf0] }
 0x175   : > { %3563 = vst [vmem:[#allocation18_spill] sm:$0xff] %v3204_v42  ;;  %v2348_v4 = vor.u32 %v2446_v9, %v2347_v8 }
 0x176   : > { %3564 = vst [vmem:[#allocation19_spill] sm:$0xff] %v3206_v36  ;;  %v3212_v54 = vpop.f32.mrf.mxu0 }
 0x177   : > { %1776 = vmatpush.bf16.msrb.mxu0 %v3082_v19 }
 0x178   : > { %1874 = vmatpush.bf16.msrb.mxu2 %v3084_v20 }
 0x17a   : > { %v3216_v55 = vpop.f32.mrf.mxu2 }
 0x17b   : > { %v3218_v46 = vpop.f32.mrf.mxu3  ;;  %1777 = vmatpush.bf16.msrb.mxu0 %v3049_v28  ;;  %v842_v3 = vpop.f32.mrf.mxu1 }
 0x17c   : > { %1875 = vmatpush.bf16.msrb.mxu2 %v3051_v29 }
 0x17e   : > { %v753_v19 = vpop.f32.mrf.mxu0 }
 0x17f   : > { %1778 = vmatpush.bf16.msrb.mxu0 %v3023_v43  ;;  %v2355_v43 = vld [vmem:[%s3535_s5 + $0x10] sm:$0xf] }
 0x180   : > { %1876 = vmatpush.bf16.msrb.mxu2 %v3025_v47  ;;  %v2448_v47 = vld [vmem:[%s3535_s5 + $0x14] sm:$0xf0] }
 0x181   : > { %v2356_v22 = vor.u32 %v2448_v47, %v2355_v43 }
 0x182   : > { %v1108_v20 = vpop.f32.mrf.mxu2  ;;  %1779 = vmatmul.bf16.vlgmr.msrb.gmra.mxu0 %v2348_v4 }
 0x183   : > { %v1197_v31 = vpop.f32.mrf.mxu3  ;;  %1877 = vmatmul.bf16.vlgmr.msrb.gmra.mxu2 %v2348_v4  ;;  %v3230_v28 = vadd.f32 %v1108_v20, %v753_v19  ;;  %v3234_v11 = vpop.f32.mrf.mxu1  ;;  %v2379_v19 = vld [vmem:[%s3535_s5 + $0x40] sm:$0xf]  ;;  %v2454_v4 = vld [vmem:[%s3535_s5 + $0x44] sm:$0xf0] }
 0x184   : > { %v3232_v29 = vadd.f32 %v1197_v31, %v842_v3  ;;  %v2380_v31 = vor.u32 %v2454_v4, %v2379_v19 }
 0x186   : > { %v3236_v32 = vpop.f32.mrf.mxu0 }
 0x18a   : > { %v3238_v41 = vpop.f32.mrf.mxu2 }
 0x18b   : > { %v3240_v51 = vpop.f32.mrf.mxu3  ;;  %v847_v53 = vpop.f32.mrf.mxu1 }
 0x18e   : > { %v758_v25 = vpop.f32.mrf.mxu0 }
 0x192   : > { %v1113_v26 = vpop.f32.mrf.mxu2  ;;  %1784 = vmatmul.bf16.gmra.mxu0 %v2356_v22 }
 0x193   : > { %v1202_v27 = vpop.f32.mrf.mxu3  ;;  %1882 = vmatmul.bf16.gmra.mxu2 %v2356_v22  ;;  %v3248_v39 = vadd.f32 %v1113_v26, %v758_v25  ;;  %v3252_v12 = vpop.f32.mrf.mxu1 }
 0x194   : > { %v3250_v61 = vadd.f32 %v1202_v27, %v847_v53  ;;  %v2387_v27 = vld [vmem:[%s3535_s5 + $0x50] sm:$0xf] }
 0x196   : > { %v3254_v18 = vpop.f32.mrf.mxu0 }
 0x19a   : > { %v3256_v33 = vpop.f32.mrf.mxu2 }
 0x19b   : > { %v3258_v62 = vpop.f32.mrf.mxu3  ;;  %v852_v49 = vpop.f32.mrf.mxu1 }
 0x19e   : > { %v763_v34 = vpop.f32.mrf.mxu0 }
 0x1a2   : > { %v1118_v1 = vpop.f32.mrf.mxu2  ;;  %1789 = vmatmul.bf16.gmra.mxu0 %v2364_v45 }
 0x1a3   : > { %v1207_v10 = vpop.f32.mrf.mxu3  ;;  %1887 = vmatmul.bf16.gmra.mxu2 %v2364_v45  ;;  %v3266_v6 = vadd.f32 %v1118_v1, %v763_v34  ;;  %v3270_v15 = vpop.f32.mrf.mxu1 }
 0x1a4   : > { %v3268_v13 = vadd.f32 %v1207_v10, %v852_v49  ;;  %v2456_v49 = vld [vmem:[%s3535_s5 + $0x54] sm:$0xf0] }
 0x1a5   : > { %v2388_v50 = vor.u32 %v2456_v49, %v2387_v27 }
 0x1a6   : > { %v3272_v21 = vpop.f32.mrf.mxu0 }
 0x1aa   : > { %v3274_v23 = vpop.f32.mrf.mxu2 }
 0x1ab   : > { %v3276_v24 = vpop.f32.mrf.mxu3  ;;  %v857_v52 = vpop.f32.mrf.mxu1 }
 0x1ae   : > { %v768_v58 = vpop.f32.mrf.mxu0 }
 0x1b2   : > { %v1123_v7 = vpop.f32.mrf.mxu2  ;;  %1794 = vmatmul.bf16.gmra.mxu0 %v2372_v57 }
 0x1b3   : > { %v1212_v2 = vpop.f32.mrf.mxu3  ;;  %1892 = vmatmul.bf16.gmra.mxu2 %v2372_v57  ;;  %v859_v0 = vpop.f32.mrf.mxu1 }
 0x1b6   : > { %v770_v60 = vpop.f32.mrf.mxu0 }
 0x1ba   : > { %v1125_v3 = vpop.f32.mrf.mxu2 }
 0x1bb   : > { %v1214_v8 = vpop.f32.mrf.mxu3  ;;  %v862_v9 = vpop.f32.mrf.mxu1 }
 0x1be   : > { %v773_v20 = vpop.f32.mrf.mxu0 }
 0x1c2   : > { %v1128_v53 = vpop.f32.mrf.mxu2  ;;  %1799 = vmatmul.bf16.gmra.mxu0 %v2380_v31 }
 0x1c3   : > { %v1217_v43 = vpop.f32.mrf.mxu3  ;;  %1897 = vmatmul.bf16.gmra.mxu2 %v2380_v31  ;;  %v864_v47 = vpop.f32.mrf.mxu1  ;;  %v1129_v31 = vadd.f32 %v1128_v53, %v773_v20  ;;  %v1215_v20 = vadd.f32 %v1214_v8, %v859_v0  ;;  %v3565_v0 = vld [vmem:[#allocation7_spill] sm:$0xff] }
 0x1c4   : > { %v1218_v17 = vadd.f32 %v1217_v43, %v862_v9 }
 0x1c6   : > { %v775_v25 = vpop.f32.mrf.mxu0 }
 0x1ca   : > { %v1130_v22 = vpop.f32.mrf.mxu2 }
 0x1cb   : > { %v1219_v26 = vpop.f32.mrf.mxu3  ;;  %v867_v59 = vpop.f32.mrf.mxu1  ;;  %v1131_v5 = vadd.f32 %v1130_v22, %v775_v25  ;;  %v1124_v25 = vadd.f32 %v1123_v7, %v768_v58  ;;  %v1126_v22 = vadd.f32 %v1125_v3, %v770_v60  ;;  %v1121_v7 = vadd.f32 %v3274_v23, %v3272_v21  ;;  %v3567_v23 = vld [vmem:[#allocation12_spill] sm:$0xff] }
 0x1cc   : > { %v1220_v57 = vadd.f32 %v1219_v26, %v864_v47  ;;  %v2458_v47 = vld [vmem:[%s3535_s5 + $0x64] sm:$0xf0]  ;;  %v1476_v26 = vadd.f32 %v2954_v56, %v1218_v17  ;;  %v1205_v21 = vadd.f32 %v3258_v62, %v3252_v12  ;;  %v1111_v12 = vadd.f32 %v3238_v41, %v3236_v32  ;;  %v2460_v41 = vld [vmem:[%s3535_s5 + $0x74] sm:$0xf0] }
 0x1cd   : > { %v1477_v9 = vadd.f32 %v2922_v44, %v1131_v5  ;;  %v1473_v60 = vadd.f32 %v3565_v0, %v1126_v22 }
 0x1ce   : > { %v778_v34 = vpop.f32.mrf.mxu0  ;;  %v1478_v53 = vadd.f32 %v2922_v44, %v1220_v57  ;;  %v1210_v44 = vadd.f32 %v3276_v24, %v3270_v15  ;;  %v1116_v15 = vadd.f32 %v3256_v33, %v3254_v18  ;;  %v1469_v24 = vadd.f32 %v3567_v23, %v1121_v7  ;;  %v3569_v33 = vld [vmem:[#allocation9_spill] sm:$0xff]  ;;  %v3572_v7 = vld [vmem:[#allocation10_spill] sm:$0xff] }
 0x1cf   : > { %v1537_v5 = vmax.f32 %v1473_v60, 0.0  ;;  %v1200_v18 = vadd.f32 %v3240_v51, %v3234_v11  ;;  %v2403_v11 = vld [vmem:[%s3535_s5 + $0x70] sm:$0xf]  ;;  %v1106_v51 = vadd.f32 %v3216_v55, %v3212_v54  ;;  %v3573_v55 = vld [vmem:[#allocation17_spill] sm:$0xff] }
 0x1d0   : > { %v1465_v62 = vadd.f32 %v3569_v33, %v1116_v15  ;;  %v1533_v22 = vmax.f32 %v1469_v24, 0.0 }
 0x1d2   : > { %v1133_v45 = vpop.f32.mrf.mxu2  ;;  %1804 = vmatmul.bf16.gmra.mxu0 %v2388_v50 }
 0x1d3   : > { %v1222_v1 = vpop.f32.mrf.mxu3  ;;  %1902 = vmatmul.bf16.gmra.mxu2 %v2388_v50  ;;  %v1134_v10 = vadd.f32 %v1133_v45, %v778_v34  ;;  %v869_v19 = vpop.f32.mrf.mxu1  ;;  %v2395_v50 = vld [vmem:[%s3535_s5 + $0x60] sm:$0xf] }
 0x1d4   : > { %v1223_v37 = vadd.f32 %v1222_v1, %v867_v59  ;;  %v2396_v59 = vor.u32 %v2458_v47, %v2395_v50 }
 0x1d5   : > { %v1479_v42 = vadd.f32 %v2901_v38, %v1134_v10  ;;  %v1540_v10 = vmax.f32 %v1476_v26, 0.0 }
 0x1d6   : > { %v780_v4 = vpop.f32.mrf.mxu0  ;;  %v1480_v27 = vadd.f32 %v2901_v38, %v1223_v37  ;;  %v1470_v37 = vadd.f32 %v3567_v23, %v1210_v44  ;;  %v1459_v44 = vadd.f32 %v3572_v7, %v3230_v28 }
 0x1d7   : > { %v1543_v34 = vmax.f32 %v1479_v42, 0.0 }
 0x1d8   : > { %v1544_v45 = vmax.f32 %v1480_v27, 0.0  ;;  %v1523_v15 = vmax.f32 %v1459_v44, 0.0 }
 0x1da   : > { %v1135_v16 = vpop.f32.mrf.mxu2 }
 0x1db   : > { %v1224_v36 = vpop.f32.mrf.mxu3  ;;  %v1136_v49 = vadd.f32 %v1135_v16, %v780_v4  ;;  %v1213_v16 = vadd.f32 %v1212_v2, %v857_v52  ;;  %v1542_v52 = vmax.f32 %v1478_v53, 0.0  ;;  %v1357_v53 = vpop.permute.xlu0 %1356 }
 0x1dc   : > { %v1225_v35 = vadd.f32 %v1224_v36, %v869_v19  ;;  %v1475_v36 = vadd.f32 %v2954_v56, %v1129_v31  ;;  %v3566_v56 = vld [vmem:[#allocation6_spill] sm:$0xff]  ;;  %v3568_v31 = vld [vmem:[#allocation8_spill] sm:$0xff] }
 0x1dd   : > { %v1481_v43 = vadd.f32 %v2908_v40, %v1136_v49  ;;  %v1471_v17 = vadd.f32 %v3566_v56, %v1124_v25  ;;  %v1472_v42 = vadd.f32 %v3566_v56, %v1213_v16  ;;  %v1592_v4 = vpack.c.bf16 %v1542_v52, %v1540_v10  ;;  %v1347_v52 = vpop.permute.xlu1 %1346 }
 0x1de   : > { %v1482_v38 = vadd.f32 %v2908_v40, %v1225_v35  ;;  %v1474_v40 = vadd.f32 %v3565_v0, %v1215_v20  ;;  %v1541_v35 = vmax.f32 %v1477_v9, 0.0  ;;  %v1539_v8 = vmax.f32 %v1475_v36, 0.0  ;;  %v3571_v36 = vld [vmem:[#allocation11_spill] sm:$0xff] }
 0x1df   : > { %v1545_v1 = vmax.f32 %v1481_v43, 0.0  ;;  %v1467_v27 = vadd.f32 %v3568_v31, %v3266_v6  ;;  %v1468_v49 = vadd.f32 %v3568_v31, %v3268_v13  ;;  %v1535_v50 = vmax.f32 %v1471_v17, 0.0  ;;  %v3570_v13 = vld [vmem:[#allocation14_spill] sm:$0xff]  ;;  %v3575_v17 = vld [vmem:[#allocation13_spill] sm:$0xff] }
 0x1e0   : > { %v1546_v58 = vmax.f32 %v1482_v38, 0.0  ;;  %v1538_v57 = vmax.f32 %v1474_v40, 0.0  ;;  %v1591_v19 = vpack.c.bf16 %v1541_v35, %v1539_v8  ;;  %v1536_v47 = vmax.f32 %v1472_v42, 0.0  ;;  %v3576_v8 = vld [vmem:[#allocation19_spill] sm:$0xff] }
 0x1e1   : > { %v1593_v2 = vpack.c.bf16 %v1545_v1, %v1543_v34  ;;  %v1466_v25 = vadd.f32 %v3569_v33, %v1205_v21  ;;  %v1534_v20 = vmax.f32 %v1470_v37, 0.0  ;;  %v1589_v6 = vpack.c.bf16 %v1537_v5, %v1535_v50 }
 0x1e2   : > { %v1594_v3 = vpack.c.bf16 %v1546_v58, %v1544_v45  ;;  %1809 = vmatmul.bf16.gmra.mxu0 %v2396_v59  ;;  %v1590_v9 = vpack.c.bf16 %v1538_v57, %v1536_v47  ;;  %v1463_v43 = vadd.f32 %v3570_v13, %v3248_v39  ;;  %v1464_v38 = vadd.f32 %v3570_v13, %v3250_v61  ;;  %v3577_v57 = vld [vmem:[#allocation15_spill] sm:$0xff]  ;;  %v2357_v13 = vld [vmem:[%s3535_s5 + $0x18] sm:$0xf0] }
 0x1e3   : > { %1907 = vmatmul.bf16.gmra.mxu2 %v2396_v59  ;;  %1820 = vmatpush.bf16.msrb.mxu1 %v1593_v2  ;;  %v1531_v16 = vmax.f32 %v1467_v27, 0.0  ;;  %v1532_v32 = vmax.f32 %v1468_v49, 0.0  ;;  %v1195_v39 = vadd.f32 %v3218_v46, %v3210_v48  ;;  %v1461_v61 = vadd.f32 %v3571_v36, %v1111_v12 }
 0x1e4   : > { %1918 = vmatpush.bf16.msrb.mxu3 %v1594_v3  ;;  %v1462_v26 = vadd.f32 %v3571_v36, %v1200_v18  ;;  %v1529_v45 = vmax.f32 %v1465_v62, 0.0  ;;  %v1530_v1 = vmax.f32 %v1466_v25, 0.0  ;;  %v2404_v58 = vor.u32 %v2460_v41, %v2403_v11  ;;  %v2445_v25 = vld [vmem:[%s3535_s5 + $0x4] sm:$0xf]  ;;  %v2451_v11 = vld [vmem:[%s3535_s5 + $0x34] sm:$0xf] }
 0x1e5   : > { %v1587_v59 = vpack.c.bf16 %v1533_v22, %v1531_v16  ;;  %v1588_v34 = vpack.c.bf16 %v1534_v20, %v1532_v32  ;;  %v1460_v0 = vadd.f32 %v3572_v7, %v3232_v29  ;;  %v1527_v60 = vmax.f32 %v1463_v43, 0.0  ;;  %v3574_v29 = vld [vmem:[#allocation18_spill] sm:$0xff]  ;;  %v2349_v22 = vld [vmem:[%s3535_s5 + $0x8] sm:$0xf0]  ;;  %v2373_v41 = vld [vmem:[%s3535_s5 + $0x38] sm:$0xf0] }
 0x1e6   : > { %v1528_v54 = vmax.f32 %v1464_v38, 0.0  ;;  %v1101_v48 = vadd.f32 %v3200_v30, %v3194_v63  ;;  %v1190_v46 = vadd.f32 %v3573_v55, %v3190_v14  ;;  %v1457_v40 = vadd.f32 %v1357_v53, %v1106_v51  ;;  %v1342_v14 = vpop.permute.xlu0 %1341  ;;  %v2449_v38 = vld [vmem:[%s3535_s5 + $0x24] sm:$0xf]  ;;  %v2365_v16 = vld [vmem:[%s3535_s5 + $0x28] sm:$0xf0] }
 0x1e7   : > { %1821 = vmatpush.bf16.msrb.mxu1 %v1591_v19  ;;  %v1458_v35 = vadd.f32 %v1357_v53, %v1195_v39  ;;  %v1585_v2 = vpack.c.bf16 %v1529_v45, %v1527_v60  ;;  %v1525_v56 = vmax.f32 %v1461_v61, 0.0  ;;  %v1526_v28 = vmax.f32 %v1462_v26, 0.0  ;;  %v2447_v53 = vld [vmem:[%s3535_s5 + $0x14] sm:$0xf]  ;;  %v2453_v39 = vld [vmem:[%s3535_s5 + $0x44] sm:$0xf]  ;;  %v3400_v45 = vpop.permute.xlu2 %1683 }
 0x1e8   : > { %1919 = vmatpush.bf16.msrb.mxu3 %v1592_v4  ;;  %v1586_v3 = vpack.c.bf16 %v1530_v1, %v1528_v54  ;;  %v1455_v42 = vadd.f32 %v3575_v17, %v3574_v29  ;;  %v1456_v10 = vadd.f32 %v3575_v17, %v3576_v8  ;;  %v1524_v63 = vmax.f32 %v1460_v0, 0.0  ;;  %v3578_v4 = vld [vmem:[#allocation16_spill] sm:$0xff]  ;;  %v2381_v36 = vld [vmem:[%s3535_s5 + $0x48] sm:$0xf0]  ;;  %v3402_v1 = vpop.permute.xlu1 %1673 }
 0x1e9   : > { %v1453_v30 = vadd.f32 %v1347_v52, %v1101_v48  ;;  %v1454_v21 = vadd.f32 %v1347_v52, %v1190_v46  ;;  %v1583_v23 = vpack.c.bf16 %v1525_v56, %v1523_v15  ;;  %v1521_v37 = vmax.f32 %v1457_v40, 0.0  ;;  %v2455_v26 = vld [vmem:[%s3535_s5 + $0x54] sm:$0xf]  ;;  %v2397_v7 = vld [vmem:[%s3535_s5 + $0x68] sm:$0xf0] }
 0x1ea   : > { %v1584_v24 = vpack.c.bf16 %v1526_v28, %v1524_v63  ;;  %v1522_v5 = vmax.f32 %v1458_v35, 0.0  ;;  %v1451_v19 = vadd.f32 %v1342_v14, %v3577_v57  ;;  %v1452_v31 = vadd.f32 %v1342_v14, %v3578_v4  ;;  %v2459_v35 = vld [vmem:[%s3535_s5 + $0x74] sm:$0xf]  ;;  %v2405_v52 = vld [vmem:[%s3535_s5 + $0x78] sm:$0xf0] }
 0x1eb   : > { %1822 = vmatpush.bf16.msrb.mxu1 %v1589_v6  ;;  %v1519_v27 = vmax.f32 %v1455_v42, 0.0  ;;  %v1520_v49 = vmax.f32 %v1456_v10, 0.0  ;;  %v1517_v50 = vmax.f32 %v1453_v30, 0.0  ;;  %v1518_v47 = vmax.f32 %v1454_v21, 0.0 }
 0x1ec   : > { %1920 = vmatpush.bf16.msrb.mxu3 %v1590_v9  ;;  %v1515_v33 = vmax.f32 %v1451_v19, 0.0  ;;  %v1516_v62 = vmax.f32 %v1452_v31, 0.0  ;;  %v2352_v9 = vor.u32 %v2445_v25, %v2349_v22  ;;  %v2360_v43 = vor.u32 %v2447_v53, %v2357_v13 }
 0x1ed   : > { %v1581_v12 = vpack.c.bf16 %v1521_v37, %v1519_v27  ;;  %v1582_v18 = vpack.c.bf16 %v1522_v5, %v1520_v49  ;;  %v2368_v32 = vor.u32 %v2449_v38, %v2365_v16  ;;  %v2376_v51 = vor.u32 %v2451_v11, %v2373_v41 }
 0x1ee   : > { %v1579_v20 = vpack.c.bf16 %v1517_v50, %v1515_v33  ;;  %v1580_v6 = vpack.c.bf16 %v1518_v47, %v1516_v62  ;;  %v2384_v61 = vor.u32 %v2453_v39, %v2381_v36  ;;  %v2408_v56 = vor.u32 %v2459_v35, %v2405_v52 }
 0x1ef   : > { %1823 = vmatpush.bf16.msrb.mxu1 %v1587_v59  ;;  %v2389_v59 = vld [vmem:[%s3535_s5 + $0x58] sm:$0xf0]  ;;  %v3410_v44 = vpop.permute.xlu2 %1678 }
 0x1f0   : > { %1921 = vmatpush.bf16.msrb.mxu3 %v1588_v34  ;;  %v2392_v34 = vor.u32 %v2455_v26, %v2389_v59  ;;  %v3412_v54 = vpop.permute.xlu1 %1668 }
 0x1f2   : > { %1814 = vmatmul.bf16.gmra.mxu0 %v2404_v58 }
 0x1f3   : > { %1912 = vmatmul.bf16.gmra.mxu2 %v2404_v58  ;;  %1824 = vmatpush.bf16.msrb.mxu1 %v1585_v2  ;;  %v2457_v58 = vld [vmem:[%s3535_s5 + $0x64] sm:$0xf]  ;;  %v3424_v2 = vpop.permute.xlu0 %1688 }
 0x1f4   : > { %1922 = vmatpush.bf16.msrb.mxu3 %v1586_v3  ;;  %v2400_v60 = vor.u32 %v2457_v58, %v2397_v7 }
 0x1f7   : > { %1825 = vmatpush.bf16.msrb.mxu1 %v1583_v23  ;;  %v3414_v55 = vpop.permute.xlu2 %1653 }
 0x1f8   : > { %1923 = vmatpush.bf16.msrb.mxu3 %v1584_v24  ;;  %v3416_v40 = vpop.permute.xlu1 %1643 }
 0x1fb   : > { %1826 = vmatpush.bf16.msrb.mxu1 %v1581_v12  ;;  %v3430_v42 = vpop.permute.xlu0 %1663 }
 0x1fc   : > { %1924 = vmatpush.bf16.msrb.mxu3 %v1582_v18 }
 0x1ff   : > { %1827 = vmatpush.bf16.msrb.mxu1 %v1579_v20  ;;  %v1780_v0 = vpop.f32.mrf.mxu0  ;;  %v3426_v28 = vpop.permute.xlu2 %1648 }
 0x200   : > { %1925 = vmatpush.bf16.msrb.mxu3 %v1580_v6  ;;  %v3428_v17 = vpop.permute.xlu1 %1638 }
 0x202   : > { %1828 = vmatmul.bf16.vlgmr.msrb.gmra.mxu1 %v2352_v9 }
 0x203   : > { %1926 = vmatmul.bf16.vlgmr.msrb.gmra.mxu3 %v2352_v9  ;;  %v3432_v21 = vpop.permute.xlu0 %1658 }
 0x206   : > { %v1878_v48 = vpop.f32.mrf.mxu2 }
 0x207   : > { %v1782_v46 = vpop.f32.mrf.mxu0  ;;  %v1624_v10 = vpop.permute.xlu2 %1623 }
 0x208   : > { %v1614_v63 = vpop.permute.xlu1 %1613 }
 0x209   : > { %v1781_v14 = vadd.f32 %v1780_v0, %v1614_v63  ;;  %v1879_v5 = vadd.f32 %v1878_v48, %v1614_v63 }
 0x20b   : > { %v1634_v50 = vpop.permute.xlu0 %1633 }
 0x20e   : > { %v1880_v3 = vpop.f32.mrf.mxu2 }
 0x20f   : > { %v1785_v29 = vpop.f32.mrf.mxu0  ;;  %v1619_v37 = vpop.permute.xlu2 %1618 }
 0x210   : > { %v1783_v4 = vadd.f32 %v1782_v46, %v1619_v37  ;;  %v1881_v33 = vadd.f32 %v1880_v3, %v1619_v37  ;;  %v1786_v22 = vadd.f32 %v1785_v29, %v1624_v10 }
 0x212   : > { %1833 = vmatmul.bf16.gmra.mxu1 %v2360_v43 }
 0x213   : > { %1931 = vmatmul.bf16.gmra.mxu3 %v2360_v43  ;;  %v1629_v16 = vpop.permute.xlu0 %1628 }
 0x216   : > { %v1883_v8 = vpop.f32.mrf.mxu2 }
 0x217   : > { %v1787_v15 = vpop.f32.mrf.mxu0 }
 0x21e   : > { %v1885_v24 = vpop.f32.mrf.mxu2 }
 0x21f   : > { %v1790_v57 = vpop.f32.mrf.mxu0  ;;  %v1886_v58 = vadd.f32 %v1885_v24, %v1629_v16 }
 0x222   : > { %1838 = vmatmul.bf16.gmra.mxu1 %v2368_v32 }
 0x223   : > { %1936 = vmatmul.bf16.gmra.mxu3 %v2368_v32  ;;  %v1884_v32 = vadd.f32 %v1883_v8, %v1624_v10 }
 0x226   : > { %v1888_v18 = vpop.f32.mrf.mxu2 }
 0x227   : > { %v1792_v6 = vpop.f32.mrf.mxu0  ;;  %v1889_v10 = vadd.f32 %v1888_v18, %v1634_v50 }
 0x228   : > { %v1793_v63 = vadd.f32 %v1792_v6, %v3428_v17 }
 0x22e   : > { %v1890_v11 = vpop.f32.mrf.mxu2 }
 0x22f   : > { %v1795_v26 = vpop.f32.mrf.mxu0 }
 0x232   : > { %1843 = vmatmul.bf16.gmra.mxu1 %v2376_v51 }
 0x233   : > { %1941 = vmatmul.bf16.gmra.mxu3 %v2376_v51  ;;  %v1788_v51 = vadd.f32 %v1787_v15, %v1629_v16 }
 0x236   : > { %v1893_v46 = vpop.f32.mrf.mxu2 }
 0x237   : > { %v1797_v8 = vpop.f32.mrf.mxu0 }
 0x238   : > { %v1798_v6 = vadd.f32 %v1797_v8, %v3426_v28 }
 0x23e   : > { %v1895_v24 = vpop.f32.mrf.mxu2 }
 0x242   : > { %1848 = vmatmul.bf16.gmra.mxu1 %v2384_v61 }
 0x243   : > { %1946 = vmatmul.bf16.gmra.mxu3 %v2384_v61 }
 0x252   : > { %1853 = vmatmul.bf16.gmra.mxu1 %v2392_v34 }
 0x253   : > { %1951 = vmatmul.bf16.gmra.mxu3 %v2392_v34 }
 0x262   : > { %1858 = vmatmul.bf16.gmra.mxu1 %v2400_v60 }
 0x263   : > { %1956 = vmatmul.bf16.gmra.mxu3 %v2400_v60  ;;  %v1791_v60 = vadd.f32 %v1790_v57, %v1634_v50  ;;  %v1891_v57 = vadd.f32 %v1890_v11, %v3428_v17 }
 0x272   : > { %1863 = vmatmul.bf16.gmra.mxu1 %v2408_v56 }
 0x273   : > { %1961 = vmatmul.bf16.gmra.mxu3 %v2408_v56 }
 0x27f   : > { %v1829_v30 = vpop.f32.mrf.mxu1 }
 0x280   : > { %v1830_v23 = vadd.f32 %v1829_v30, %v1781_v14 }
 0x282   : > { %v1967_v47 = vmax.f32 %v1830_v23, 0.0 }
 0x286   : > { %v1927_v19 = vpop.f32.mrf.mxu3 }
 0x287   : > { %v1928_v31 = vadd.f32 %v1927_v19, %v1879_v5  ;;  %v1831_v27 = vpop.f32.mrf.mxu1 }
 0x288   : > { %v1832_v49 = vadd.f32 %v1831_v27, %v1783_v4  ;;  %v1800_v4 = vpop.f32.mrf.mxu0  ;;  %v1796_v27 = vadd.f32 %v1795_v26, %v3416_v40 }
 0x289   : > { %v1968_v53 = vmax.f32 %v1928_v31, 0.0 }
 0x28a   : > { %v1969_v12 = vmax.f32 %v1832_v49, 0.0 }
 0x28c   : > { %v3434_v62 = vpack.c.bf16 %v1969_v12, %v1967_v47 }
 0x28e   : > { %v1929_v25 = vpop.f32.mrf.mxu3 }
 0x28f   : > { %v1930_v20 = vadd.f32 %v1929_v25, %v1881_v33  ;;  %v1834_v9 = vpop.f32.mrf.mxu1  ;;  %v1898_v25 = vpop.f32.mrf.mxu2 }
 0x290   : > { %v1835_v43 = vadd.f32 %v1834_v9, %v1786_v22  ;;  %v1894_v22 = vadd.f32 %v1893_v46, %v3416_v40  ;;  %v3451_v9 = vpop.f32.mrf.mxu0 }
 0x291   : > { %v1970_v13 = vmax.f32 %v1930_v20, 0.0 }
 0x292   : > { %v1971_v59 = vmax.f32 %v1835_v43, 0.0 }
 0x293   : > { %v3436_v38 = vpack.c.bf16 %v1970_v13, %v1968_v53 }
 0x296   : > { %v1932_v41 = vpop.f32.mrf.mxu3 }
 0x297   : > { %v1933_v39 = vadd.f32 %v1932_v41, %v1884_v32  ;;  %v1836_v36 = vpop.f32.mrf.mxu1  ;;  %v1896_v32 = vadd.f32 %v1895_v24, %v3426_v28  ;;  %v3456_v41 = vpop.f32.mrf.mxu2 }
 0x298   : > { %v1837_v61 = vadd.f32 %v1836_v36, %v1788_v51 }
 0x299   : > { %v1972_v52 = vmax.f32 %v1933_v39, 0.0  ;;  %v1801_v39 = vadd.f32 %v1800_v4, %v3414_v55 }
 0x29a   : > { %v1973_v34 = vmax.f32 %v1837_v61, 0.0 }
 0x29c   : > { %v3438_v7 = vpack.c.bf16 %v1973_v34, %v1971_v59  ;;  %v1805_v34 = vpop.f32.mrf.mxu0 }
 0x29e   : > { %v1934_v0 = vpop.f32.mrf.mxu3 }
 0x29f   : > { %v1935_v48 = vadd.f32 %v1934_v0, %v1886_v58  ;;  %v1839_v35 = vpop.f32.mrf.mxu1  ;;  %v1899_v0 = vadd.f32 %v1898_v25, %v3414_v55 }
 0x2a0   : > { %v1840_v56 = vadd.f32 %v1839_v35, %v1791_v60 }
 0x2a1   : > { %v1974_v3 = vmax.f32 %v1935_v48, 0.0  ;;  %v1903_v48 = vpop.f32.mrf.mxu2 }
 0x2a2   : > { %v1975_v37 = vmax.f32 %v1840_v56, 0.0 }
 0x2a3   : > { %v3440_v29 = vpack.c.bf16 %v1974_v3, %v1972_v52 }
 0x2a4   : > { %v1807_v35 = vpop.f32.mrf.mxu0 }
 0x2a6   : > { %v1937_v15 = vpop.f32.mrf.mxu3 }
 0x2a7   : > { %v1938_v14 = vadd.f32 %v1937_v15, %v1889_v10  ;;  %v1841_v30 = vpop.f32.mrf.mxu1 }
 0x2a8   : > { %v1842_v23 = vadd.f32 %v1841_v30, %v1793_v63 }
 0x2a9   : > { %v1976_v50 = vmax.f32 %v1938_v14, 0.0  ;;  %v1905_v56 = vpop.f32.mrf.mxu2 }
 0x2aa   : > { %v1977_v5 = vmax.f32 %v1842_v23, 0.0 }
 0x2ac   : > { %v3444_v19 = vpack.c.bf16 %v1977_v5, %v1975_v37  ;;  %v1810_v8 = vpop.f32.mrf.mxu0 }
 0x2ae   : > { %v1939_v31 = vpop.f32.mrf.mxu3 }
 0x2af   : > { %v1940_v49 = vadd.f32 %v1939_v31, %v1891_v57  ;;  %v1844_v47 = vpop.f32.mrf.mxu1 }
 0x2b0   : > { %v1845_v18 = vadd.f32 %v1844_v47, %v1796_v27 }
 0x2b1   : > { %v1978_v12 = vmax.f32 %v1940_v49, 0.0  ;;  %v1908_v63 = vpop.f32.mrf.mxu2 }
 0x2b2   : > { %v1979_v43 = vmax.f32 %v1845_v18, 0.0 }
 0x2b3   : > { %v3447_v33 = vpack.c.bf16 %v1978_v12, %v1976_v50 }
 0x2b4   : > { %v1812_v30 = vpop.f32.mrf.mxu0 }
 0x2b5   : > { %v1813_v50 = vadd.f32 %v1812_v30, %v3410_v44 }
 0x2b6   : > { %v1942_v20 = vpop.f32.mrf.mxu3 }
 0x2b7   : > { %v1943_v17 = vadd.f32 %v1942_v20, %v1894_v22  ;;  %v1846_v53 = vpop.f32.mrf.mxu1  ;;  %v1811_v22 = vadd.f32 %v1810_v8, %v3402_v1 }
 0x2b8   : > { %v1847_v13 = vadd.f32 %v1846_v53, %v1798_v6 }
 0x2b9   : > { %v1980_v61 = vmax.f32 %v1943_v17, 0.0  ;;  %v1910_v24 = vpop.f32.mrf.mxu2  ;;  %v1808_v17 = vadd.f32 %v1807_v35, %v3412_v54  ;;  %v1909_v35 = vadd.f32 %v1908_v63, %v3402_v1 }
 0x2ba   : > { %v1981_v16 = vmax.f32 %v1847_v13, 0.0 }
 0x2bc   : > { %v3454_v11 = vpack.c.bf16 %v1981_v16, %v1979_v43  ;;  %v1815_v5 = vpop.f32.mrf.mxu0 }
 0x2bd   : > { %v1816_v49 = vadd.f32 %v1815_v5, %v3400_v45 }
 0x2be   : > { %v1944_v51 = vpop.f32.mrf.mxu3 }
 0x2bf   : > { %v1945_v40 = vadd.f32 %v1944_v51, %v1896_v32  ;;  %v1849_v36 = vpop.f32.mrf.mxu1  ;;  %v1806_v51 = vadd.f32 %v1805_v34, %v3430_v42  ;;  %v1906_v34 = vadd.f32 %v1905_v56, %v3412_v54 }
 0x2c0   : > { %v3459_v59 = vadd.f32 %v1849_v36, %v1801_v39  ;;  %v1911_v39 = vadd.f32 %v1910_v24, %v3410_v44 }
 0x2c1   : > { %v1982_v26 = vmax.f32 %v1945_v40, 0.0  ;;  %v1913_v4 = vpop.f32.mrf.mxu2 }
 0x2c2   : > { %v1914_v13 = vadd.f32 %v1913_v4, %v3400_v45 }
 0x2c3   : > { %v3461_v58 = vpack.c.bf16 %v1982_v26, %v1980_v61 }
 0x2c4   : > { %v1817_v27 = vpop.f32.mrf.mxu0 }
 0x2c5   : > { %v1818_v12 = vadd.f32 %v1817_v27, %v3424_v2 }
 0x2c6   : > { %v1947_v60 = vpop.f32.mrf.mxu3 }
 0x2c7   : > { %v3464_v28 = vadd.f32 %v1947_v60, %v1899_v0  ;;  %v1851_v46 = vpop.f32.mrf.mxu1  ;;  %v1803_v60 = vadd.f32 %v3451_v9, %v3432_v21 }
 0x2c9   : > { %v1915_v53 = vpop.f32.mrf.mxu2  ;;  %v1852_v44 = vadd.f32 %v1851_v46, %v1803_v60  ;;  %v1983_v46 = vmax.f32 %v3459_v59, 0.0  ;;  %v1999_v59 = vld [vmem:[%s3537_s7] sm:$0xf] }
 0x2ca   : > { %v1916_v36 = vadd.f32 %v1915_v53, %v3424_v2 }
 0x2cb   : > { %v1985_v63 = vmax.f32 %v1852_v44, 0.0 }
 0x2ce   : > { %v3466_v52 = vpop.f32.mrf.mxu3 }
 0x2cf   : > { %v1854_v3 = vpop.f32.mrf.mxu1 }
 0x2d0   : > { %v1855_v45 = vadd.f32 %v1854_v3, %v1806_v51  ;;  %v1901_v3 = vadd.f32 %v3456_v41, %v3432_v21  ;;  %v1984_v21 = vmax.f32 %v3464_v28, 0.0 }
 0x2d2   : > { %v1987_v27 = vmax.f32 %v1855_v45, 0.0  ;;  %v1950_v56 = vadd.f32 %v3466_v52, %v1901_v3 }
 0x2d6   : > { %v1952_v10 = vpop.f32.mrf.mxu3 }
 0x2d7   : > { %v1856_v15 = vpop.f32.mrf.mxu1 }
 0x2d8   : > { %v1857_v40 = vadd.f32 %v1856_v15, %v1808_v17 }
 0x2da   : > { %v1989_v15 = vmax.f32 %v1857_v40, 0.0 }
 0x2de   : > { %v1954_v14 = vpop.f32.mrf.mxu3 }
 0x2df   : > { %v1859_v23 = vpop.f32.mrf.mxu1  ;;  %v1955_v9 = vadd.f32 %v1954_v14, %v1906_v34  ;;  %v1986_v14 = vmax.f32 %v1950_v56, 0.0 }
 0x2e0   : > { %v1860_v43 = vadd.f32 %v1859_v23, %v1811_v22 }
 0x2e1   : > { %v2009_v41 = vpack.c.bf16 %v1986_v14, %v1984_v21 }
 0x2e2   : > { %v1991_v30 = vmax.f32 %v1860_v43, 0.0 }
 0x2e6   : > { %v1957_v37 = vpop.f32.mrf.mxu3 }
 0x2e7   : > { %v1861_v55 = vpop.f32.mrf.mxu1  ;;  %v1958_v24 = vadd.f32 %v1957_v37, %v1909_v35  ;;  %v1990_v37 = vmax.f32 %v1955_v9, 0.0 }
 0x2e8   : > { %v1862_v20 = vadd.f32 %v1861_v55, %v1813_v50 }
 0x2e9   : > { %v1992_v54 = vmax.f32 %v1958_v24, 0.0 }
 0x2ea   : > { %v1993_v61 = vmax.f32 %v1862_v20, 0.0 }
 0x2ec   : > { %v2012_v2 = vpack.c.bf16 %v1993_v61, %v1991_v30 }
 0x2ee   : > { %v1959_v57 = vpop.f32.mrf.mxu3 }
 0x2ef   : > { %v1864_v31 = vpop.f32.mrf.mxu1  ;;  %v1960_v23 = vadd.f32 %v1959_v57, %v1911_v39 }
 0x2f0   : > { %v1865_v18 = vadd.f32 %v1864_v31, %v1816_v49  ;;  %v1904_v31 = vadd.f32 %v1903_v48, %v3430_v42  ;;  %v2008_v42 = vpack.c.bf16 %v1985_v63, %v1983_v46 }
 0x2f1   : > { %v1994_v49 = vmax.f32 %v1960_v23, 0.0 }
 0x2f2   : > { %v1995_v16 = vmax.f32 %v1865_v18, 0.0  ;;  %v1953_v57 = vadd.f32 %v1952_v10, %v1904_v31 }
 0x2f3   : > { %v2013_v50 = vpack.c.bf16 %v1994_v49, %v1992_v54 }
 0x2f4   : > { %v1988_v48 = vmax.f32 %v1953_v57, 0.0 }
 0x2f6   : > { %v1962_v47 = vpop.f32.mrf.mxu3 }
 0x2f7   : > { %v1866_v25 = vpop.f32.mrf.mxu1  ;;  %v1963_v26 = vadd.f32 %v1962_v47, %v1914_v13  ;;  %v2010_v47 = vpack.c.bf16 %v1989_v15, %v1987_v27 }
 0x2f8   : > { %v1867_v6 = vadd.f32 %v1866_v25, %v1818_v12  ;;  %v2011_v12 = vpack.c.bf16 %v1990_v37, %v1988_v48 }
 0x2f9   : > { %v1996_v5 = vmax.f32 %v1963_v26, 0.0 }
 0x2fa   : > { %v1997_v32 = vmax.f32 %v1867_v6, 0.0 }
 0x2fc   : > { %v2014_v0 = vpack.c.bf16 %v1997_v32, %v1995_v16 }
 0x2fe   : > { %v1964_v8 = vpop.f32.mrf.mxu3  ;;  %2016 = vmatpush.bf16.msra.mxu0 %v2014_v0 }
 0x2ff   : > { %v1965_v55 = vadd.f32 %v1964_v8, %v1916_v36 }
 0x301   : > { %v1998_v4 = vmax.f32 %v1965_v55, 0.0 }
 0x302   : > { %2017 = vmatpush.bf16.msra.mxu0 %v2012_v2 }
 0x303   : > { %v2015_v1 = vpack.c.bf16 %v1998_v4, %v1996_v5 }
 0x305   : > { %2029 = vmatpush.bf16.msra.mxu1 %v2015_v1 }
 0x306   : > { %2018 = vmatpush.bf16.msra.mxu0 %v2010_v47 }
 0x309   : > { %2030 = vmatpush.bf16.msra.mxu1 %v2013_v50 }
 0x30a   : > { %2019 = vmatpush.bf16.msra.mxu0 %v2008_v42 }
 0x30d   : > { %2031 = vmatpush.bf16.msra.mxu1 %v2011_v12 }
 0x30e   : > { %2020 = vmatpush.bf16.msra.mxu0 %v3454_v11 }
 0x311   : > { %2032 = vmatpush.bf16.msra.mxu1 %v2009_v41 }
 0x312   : > { %2021 = vmatpush.bf16.msra.mxu0 %v3444_v19 }
 0x315   : > { %2033 = vmatpush.bf16.msra.mxu1 %v3461_v58 }
 0x316   : > { %2022 = vmatpush.bf16.msra.mxu0 %v3438_v7  ;;  %v2043_v7 = vstv %s2042_s26 }
 0x319   : > { %2034 = vmatpush.bf16.msra.mxu1 %v3447_v33 }
 0x31a   : > { %2023 = vmatpush.bf16.msra.mxu0 %v3434_v62  ;;  %v2052_v62 = vlaneseq }
 0x31c   : > { %vm2054_vm3 = vcmp.lt.s32.totalorder %v2052_v62, 256 }
 0x31d   : > { %2035 = vmatpush.bf16.msra.mxu1 %v3440_v29  ;;  %2024 = vmatmul.bf16.vlgmr.msra.gmra.mxu0 %v1999_v59 }
 0x321   : > { %2036 = vmatpush.bf16.msra.mxu1 %v3436_v38 }
 0x324   : > { %2037 = vmatmul.bf16.vlgmr.msra.gmra.mxu1 %v1999_v59 }
 0x39a   : > { %v2025_v19 = vpop.f32.mrf.mxu0 }
 0x39b   : > { %v2044_v29 = vadd.f32 %v2043_v7, %v2025_v19 }
 0x3a1   : > { %v2038_v33 = vpop.f32.mrf.mxu1 }
 0x3a2   : > { %v2045_v11 = vadd.f32 %v2043_v7, %v2038_v33  ;;  %v2027_v38 = vpop.f32.mrf.mxu0 }
 0x3a4   : > { %v2048_v58 = vrot.slane %v2045_v11, 7 }
 0x3a6   : > { %v2050_v28 = vsel %vm2049_vm2, %v2044_v29, %v2048_v58 }
 0x3a7   : > { %2056 = vst.msk [vmem:[%s343_s22] sm:$0x3] %vm2054_vm3, %v2050_v28 }
 0x3a8   : > { %2531 = shalt.err (!%p2528_p3)
}
 0x3a9   : > { %2461 = dma.vmem_to_hbm [thread:$0]  (%p2660_p5), %s2071_s23, 32, %s2073_s10, %s2058_s8   ;;  %v2040_v52 = vpop.f32.mrf.mxu1 }
 0x3aa PF: > { %p2467_p4 = scmp.ge.s32.totalorder %s2566_s14, 2  ;;  %s2084_s27 = sand.u32 1, %s2554_s11  }
 0x3ab   : > { %s2085_s17 = scalar_lea.sflag [#allocation4], %s2084_s27 }
 0x3ac   : > { %p2464_p7 = pnand %p2467_p4, %p2664_p6 }
 0x3ae   : > { %p2465_p8 = pneg %p2464_p7 }
 0x3b0   : > { %2549 = dma.done.wait (%p2465_p8), %s2085_s17, 32  }
 0x3b1   : > { %2551 = vsyncadd (%p2465_p8), %s2085_s17, 4294967264  ;;  %p20_p9 = scmp.ge.s32.totalorder %s2647_s16, 4   ;;  %s3579_s11 = smov %s2558_s12 }
 0x3b2   : > { %s3580_s12 = smov %s2562_s13  ;;  %s3581_s13 = smov %s2658_s19 }
 0x3b3   : > { %s3582_s14 = smov %s2647_s16  ;;  %22 = sbr.rel (!%p20_p9) target bundleno = 5 (0x5), region = 94 }
 0x3b8   :  { %2091 = vsyncpa [#allocation4], 1 }
 0x3b9   :  { %2093 = vsyncpa [#allocation4 + $0x1], 1 }

</bundles_post_ra>
